<compile_context>
chip_gen: v7x
topology: tpu7x:2x2x1
jax: 0.10.0
libtpu: 0.0.40
codegen_flags: <defaults>
</compile_context>

<pallas_src>
import jax
import jax.numpy as jnp
from jax.experimental import pallas as pl
from jax.experimental.pallas import tpu as pltpu

# ----------------------------- configuration ---------------------------------
B = 2                  # batch
N = 16                 # tokens (sequence length)
D = 128                # patch_emb_dim (full lane width -> lane-dense matmuls)
H = 8                  # n_heads (hardcoded to 8 in TransformerBlock)
DH = D // H            # head_dim
MLP_DIM = 4 * D        # mlp_expand = 4
LN_EPS = 1e-5          # torch.nn.LayerNorm default


# ------------------------------ in-kernel math --------------------------------
def _layer_norm(x, w, b):
    mu = jnp.mean(x, axis=-1, keepdims=True)
    var = jnp.mean(jnp.square(x - mu), axis=-1, keepdims=True)
    return (x - mu) * jax.lax.rsqrt(var + LN_EPS) * w + b


def _gelu_exact(x):
    # matches torch.nn.GELU() (erf formulation), kept in f32
    return 0.5 * x * (1.0 + jax.lax.erf(x * (2.0 ** -0.5)))


# ------------------------------- Pallas kernel --------------------------------
def _block_kernel(x_ref, lnw_ref, lnb_ref, wqkv_ref, bqkv_ref,
                  woh_ref, bo_ref, w1_ref, b1_ref, w2_ref, b2_ref, o_ref):
    """x -> LN -> MHSA -> +res -> LN (same params) -> MLP -> +res."""
    spb, n, d = x_ref.shape               # sequences per step, seq len, model dim
    tok = spb * n
    n_heads, dh, _ = woh_ref.shape

    x = x_ref[...].reshape(tok, d)         # (TOK, D) f32
    lnw = lnw_ref[...]                     # (1, D)  f32
    lnb = lnb_ref[...]

    # ---- LN -> fused QKV projection (single lane-dense bf16 matmul, f32 acc)
    xn = _layer_norm(x, lnw, lnb)
    qkv = jnp.dot(xn.astype(jnp.bfloat16), wqkv_ref[...],
                  preferred_element_type=jnp.float32) + bqkv_ref[...]
    qkv = qkv.astype(jnp.bfloat16)         # (TOK, 3D), Q part pre-scaled

    # ---- marshal Q/K/V into the batched head layout (registers only):
    #      (TOK, H*DH) -> (H, TOK, DH) -> (H*spb, N, DH); only leading dims are
    #      reshaped, no scratch VMEM, no masked stores.
    def to_heads(m2d):
        m = jnp.stack([m2d[:, i * dh:(i + 1) * dh] for i in range(n_heads)],
                      axis=0)              # (H, TOK, DH)
        return m.reshape(n_heads * spb, n, dh)

    q = to_heads(qkv[:, :d])               # already scaled by 1/sqrt(head_dim)
    k = to_heads(qkv[:, d:2 * d])
    v = to_heads(qkv[:, 2 * d:])

    # ---- ONE batched contraction for all (head, sequence) pairs
    s = jnp.einsum('zid,zjd->zij', q, k,
                   preferred_element_type=jnp.float32)      # (H*spb, N, N) f32
    s = s - jnp.max(s, axis=-1, keepdims=True)
    p = jnp.exp(s)
    p = p / jnp.sum(p, axis=-1, keepdims=True)               # exact divide
    ctx = jnp.einsum('zij,zjd->zid', p.astype(jnp.bfloat16), v,
                     preferred_element_type=jnp.float32)     # (H*spb, N, DH)

    # ---- output projection: batched per-head dot + reduce over heads, then
    #      residual 1 (avoids re-assembling the context through lane stores).
    ctx = ctx.reshape(n_heads, tok, dh).astype(jnp.bfloat16)  # (H, TOK, DH)
    attn = jnp.einsum('htd,hde->hte', ctx, woh_ref[...],
                      preferred_element_type=jnp.float32)     # (H, TOK, D)
    attn = jnp.sum(attn, axis=0) + bo_ref[...]
    x2 = x + attn

    # ---- LN (same weights: the module reuses self.norm) -> MLP -> residual 2
    xn2 = _layer_norm(x2, lnw, lnb)
    h1 = jnp.dot(xn2.astype(jnp.bfloat16), w1_ref[...],
                 preferred_element_type=jnp.float32) + b1_ref[...]
    h1 = _gelu_exact(h1)
    h2 = jnp.dot(h1.astype(jnp.bfloat16), w2_ref[...],
                 preferred_element_type=jnp.float32) + b2_ref[...]
    o_ref[...] = (x2 + h2).reshape(spb, n, d)   # lane-dense f32 store


# ------------------------------ pallas_call wrapper ----------------------------
def _seqs_per_block(batch, seq_len, target_tokens=256):
    """Sequences per grid step: aim for >=target_tokens rows (MXU fill) while
    evenly dividing the batch; attention never crosses a sequence boundary."""
    spb = min(batch, max(1, -(-target_tokens // seq_len)))
    while batch % spb:
        spb -= 1
    return spb


def transformer_block(x, p):
    b, n, d = x.shape
    n_heads = p['wo_h'].shape[0]
    mlp = p['w1'].shape[1]
    spb = _seqs_per_block(b, n)
    grid = (b // spb,)

    tok_total = b * n
    flops = 2 * tok_total * d * (3 * d + 2 * n + d + 2 * mlp)
    transcendentals = tok_total * (n_heads * n + mlp + 2)
    weight_bytes = sum(int(v.size) * v.dtype.itemsize for v in p.values())
    bytes_accessed = 2 * int(x.size) * 4 + weight_bytes

    seq_spec = pl.BlockSpec((spb, n, d), lambda i: (i, 0, 0))

    def const_spec(arr):   # full array, resident across all grid steps
        return pl.BlockSpec(arr.shape, lambda i, _r=len(arr.shape): (0,) * _r)

    args = (x, p['ln_w'], p['ln_b'], p['wqkv'], p['bqkv'],
            p['wo_h'], p['bo'], p['w1'], p['b1'], p['w2'], p['b2'])
    in_specs = [seq_spec] + [const_spec(a) for a in args[1:]]

    out = pl.pallas_call(
        _block_kernel,
        out_shape=jax.ShapeDtypeStruct((b, n, d), jnp.float32),
        grid=grid,
        in_specs=in_specs,
        out_specs=seq_spec,
        compiler_params=pltpu.CompilerParams(
            dimension_semantics=("parallel",)),
        cost_estimate=pl.CostEstimate(
            flops=int(flops),
            transcendentals=int(transcendentals),
            bytes_accessed=int(bytes_accessed)),
    )(*args)
    return out


# ------------------------------ parameters (synthetic) -------------------------
def init_params(key):
    """f32 parameters mirroring the PyTorch module (weights in (in, out) layout)."""
    ks = iter(jax.random.split(key, 16))

    def nrm(shape, scale=0.02):
        return scale * jax.random.normal(next(ks), shape, jnp.float32)

    return {
        'ln_w': jnp.ones((1, D), jnp.float32),
        'ln_b': jnp.zeros((1, D), jnp.float32),
        'wq': nrm((D, D)), 'bq': nrm((1, D)),
        'wk': nrm((D, D)), 'bk': nrm((1, D)),
        'wv': nrm((D, D)), 'bv': nrm((1, D)),
        'wo': nrm((D, D)), 'bo': nrm((1, D)),
        'w1': nrm((D, MLP_DIM)), 'b1': nrm((1, MLP_DIM)),
        'w2': nrm((MLP_DIM, D)), 'b2': nrm((1, D)),
    }


def prepare_params(p):
    """One-time packing (outside jit): fuse QKV, fold 1/sqrt(head_dim) into Q,
    pre-split wo by head as (H, DH, D), cast matmul weights to bf16 (biases and
    LN params stay f32)."""
    inv_scale = 1.0 / (float(DH) ** 0.5)
    wqkv = jnp.concatenate([p['wq'] * inv_scale, p['wk'], p['wv']], axis=1)
    bqkv = jnp.concatenate([p['bq'] * inv_scale, p['bk'], p['bv']], axis=1)
    return {
        'ln_w': p['ln_w'], 'ln_b': p['ln_b'],
        'wqkv': wqkv.astype(jnp.bfloat16), 'bqkv': bqkv,
        'wo_h': p['wo'].reshape(H, DH, D).astype(jnp.bfloat16), 'bo': p['bo'],
        'w1': p['w1'].astype(jnp.bfloat16), 'b1': p['b1'],
        'w2': p['w2'].astype(jnp.bfloat16), 'b2': p['b2'],
    }


# ----------------------------------- main --------------------------------------
if __name__ == "__main__":
    key = jax.random.PRNGKey(0)
    pkey, xkey = jax.random.split(key)
    params = prepare_params(init_params(pkey))            # one-time, outside jit
    x = jax.random.normal(xkey, (B, N, D), jnp.float32)   # (b, n, d) module input

    fwd = jax.jit(transformer_block)
    out = jax.block_until_ready(fwd(x, params))
    assert out.shape == (B, N, D) and out.dtype == jnp.float32
    assert bool(jnp.all(jnp.isfinite(out)))
    print("KERNEL_OK")
</pallas_src>

<mosaic_0001>
module attributes {stable_mosaic.version = 11 : i64} {
  func.func @_block_kernel(%arg0: i32, %arg1: memref<2x16x128xf32, #tpu.memory_space<vmem>>, %arg2: memref<1x128xf32, #tpu.memory_space<vmem>>, %arg3: memref<1x128xf32, #tpu.memory_space<vmem>>, %arg4: memref<128x384xbf16, #tpu.memory_space<vmem>>, %arg5: memref<1x384xf32, #tpu.memory_space<vmem>>, %arg6: memref<8x16x128xbf16, #tpu.memory_space<vmem>>, %arg7: memref<1x128xf32, #tpu.memory_space<vmem>>, %arg8: memref<128x512xbf16, #tpu.memory_space<vmem>>, %arg9: memref<1x512xf32, #tpu.memory_space<vmem>>, %arg10: memref<512x128xbf16, #tpu.memory_space<vmem>>, %arg11: memref<1x128xf32, #tpu.memory_space<vmem>>, %arg12: memref<2x16x128xf32, #tpu.memory_space<vmem>>) attributes {dimension_semantics = [#tpu.dimension_semantics<parallel>], iteration_bounds = array<i64: 1>, scalar_prefetch = 0 : i64, scratch_operands = 0 : i64, tpu.core_type = #tpu.core_type<tc>, window_params = [{transform_indices = @transform_0, window_bounds = array<i64: 2, 16, 128>}, {pipeline_mode = #tpu.pipeline_mode<synchronous>, transform_indices = @transform_1, window_bounds = array<i64: 1, 128>}, {pipeline_mode = #tpu.pipeline_mode<synchronous>, transform_indices = @transform_2, window_bounds = array<i64: 1, 128>}, {pipeline_mode = #tpu.pipeline_mode<synchronous>, transform_indices = @transform_3, window_bounds = array<i64: 128, 384>}, {pipeline_mode = #tpu.pipeline_mode<synchronous>, transform_indices = @transform_4, window_bounds = array<i64: 1, 384>}, {pipeline_mode = #tpu.pipeline_mode<synchronous>, transform_indices = @transform_5, window_bounds = array<i64: 8, 16, 128>}, {pipeline_mode = #tpu.pipeline_mode<synchronous>, transform_indices = @transform_6, window_bounds = array<i64: 1, 128>}, {pipeline_mode = #tpu.pipeline_mode<synchronous>, transform_indices = @transform_7, window_bounds = array<i64: 128, 512>}, {pipeline_mode = #tpu.pipeline_mode<synchronous>, transform_indices = @transform_8, window_bounds = array<i64: 1, 512>}, {pipeline_mode = #tpu.pipeline_mode<synchronous>, transform_indices = @transform_9, window_bounds = array<i64: 512, 128>}, {pipeline_mode = #tpu.pipeline_mode<synchronous>, transform_indices = @transform_10, window_bounds = array<i64: 1, 128>}, {transform_indices = @transform_11, window_bounds = array<i64: 2, 16, 128>}]} {
    %c0 = arith.constant 0 : index
    %c0_0 = arith.constant 0 : index
    %c0_1 = arith.constant 0 : index
    %0 = vector.load %arg1[%c0, %c0_0, %c0_1] : memref<2x16x128xf32, #tpu.memory_space<vmem>>, vector<2x16x128xf32>
    %1 = vector.shape_cast %0 : vector<2x16x128xf32> to vector<32x128xf32>
    %c0_2 = arith.constant 0 : index
    %c0_3 = arith.constant 0 : index
    %2 = vector.load %arg2[%c0_2, %c0_3] : memref<1x128xf32, #tpu.memory_space<vmem>>, vector<1x128xf32>
    %c0_4 = arith.constant 0 : index
    %c0_5 = arith.constant 0 : index
    %3 = vector.load %arg3[%c0_4, %c0_5] : memref<1x128xf32, #tpu.memory_space<vmem>>, vector<1x128xf32>
    %cst = arith.constant dense<0.000000e+00> : vector<32xf32>
    %4 = vector.multi_reduction <add>, %1, %cst [1] : vector<32x128xf32> to vector<32xf32>
    %5 = vector.shape_cast %4 : vector<32xf32> to vector<32x1xf32>
    %cst_6 = arith.constant 1.280000e+02 : f32
    %6 = vector.broadcast %cst_6 : f32 to vector<32x1xf32>
    %7 = arith.divf %5, %6 : vector<32x1xf32>
    %8 = vector.broadcast %7 : vector<32x1xf32> to vector<32x128xf32>
    %9 = arith.subf %1, %8 : vector<32x128xf32>
    %10 = arith.mulf %9, %9 : vector<32x128xf32>
    %cst_7 = arith.constant dense<0.000000e+00> : vector<32xf32>
    %11 = vector.multi_reduction <add>, %10, %cst_7 [1] : vector<32x128xf32> to vector<32xf32>
    %12 = vector.shape_cast %11 : vector<32xf32> to vector<32x1xf32>
    %cst_8 = arith.constant 1.280000e+02 : f32
    %13 = vector.broadcast %cst_8 : f32 to vector<32x1xf32>
    %14 = arith.divf %12, %13 : vector<32x1xf32>
    %15 = vector.broadcast %7 : vector<32x1xf32> to vector<32x128xf32>
    %16 = arith.subf %1, %15 : vector<32x128xf32>
    %cst_9 = arith.constant 9.99999974E-6 : f32
    %17 = vector.broadcast %cst_9 : f32 to vector<32x1xf32>
    %18 = arith.addf %14, %17 : vector<32x1xf32>
    %19 = math.rsqrt %18 : vector<32x1xf32>
    %20 = vector.broadcast %19 : vector<32x1xf32> to vector<32x128xf32>
    %21 = arith.mulf %16, %20 : vector<32x128xf32>
    %22 = vector.broadcast %2 : vector<1x128xf32> to vector<32x128xf32>
    %23 = arith.mulf %21, %22 : vector<32x128xf32>
    %24 = vector.broadcast %3 : vector<1x128xf32> to vector<32x128xf32>
    %25 = arith.addf %23, %24 : vector<32x128xf32>
    %26 = arith.truncf %25 : vector<32x128xf32> to vector<32x128xbf16>
    %c0_10 = arith.constant 0 : index
    %c0_11 = arith.constant 0 : index
    %27 = vector.load %arg4[%c0_10, %c0_11] : memref<128x384xbf16, #tpu.memory_space<vmem>>, vector<128x384xbf16>
    %cst_12 = arith.constant dense<0.000000e+00> : vector<32x384xf32>
    %28 = tpu.matmul %26, %27, %cst_12 {dimension_numbers = #tpu.dot_dimension_numbers<[1], [0], [0], [1], [0, 0, 1, 1], [], []>} : vector<32x128xbf16>, vector<128x384xbf16>, vector<32x384xf32> -> vector<32x384xf32>
    %c0_13 = arith.constant 0 : index
    %c0_14 = arith.constant 0 : index
    %29 = vector.load %arg5[%c0_13, %c0_14] : memref<1x384xf32, #tpu.memory_space<vmem>>, vector<1x384xf32>
    %30 = vector.broadcast %29 : vector<1x384xf32> to vector<32x384xf32>
    %31 = arith.addf %28, %30 : vector<32x384xf32>
    %32 = arith.truncf %31 : vector<32x384xf32> to vector<32x384xbf16>
    %33 = vector.extract_strided_slice %32 {offsets = [0, 0], sizes = [32, 128], strides = [1, 1]} : vector<32x384xbf16> to vector<32x128xbf16>
    %34 = vector.extract_strided_slice %33 {offsets = [0, 0], sizes = [32, 16], strides = [1, 1]} : vector<32x128xbf16> to vector<32x16xbf16>
    %35 = vector.extract_strided_slice %33 {offsets = [0, 16], sizes = [32, 16], strides = [1, 1]} : vector<32x128xbf16> to vector<32x16xbf16>
    %36 = vector.extract_strided_slice %33 {offsets = [0, 32], sizes = [32, 16], strides = [1, 1]} : vector<32x128xbf16> to vector<32x16xbf16>
    %37 = vector.extract_strided_slice %33 {offsets = [0, 48], sizes = [32, 16], strides = [1, 1]} : vector<32x128xbf16> to vector<32x16xbf16>
    %38 = vector.extract_strided_slice %33 {offsets = [0, 64], sizes = [32, 16], strides = [1, 1]} : vector<32x128xbf16> to vector<32x16xbf16>
    %39 = vector.extract_strided_slice %33 {offsets = [0, 80], sizes = [32, 16], strides = [1, 1]} : vector<32x128xbf16> to vector<32x16xbf16>
    %40 = vector.extract_strided_slice %33 {offsets = [0, 96], sizes = [32, 16], strides = [1, 1]} : vector<32x128xbf16> to vector<32x16xbf16>
    %41 = vector.extract_strided_slice %33 {offsets = [0, 112], sizes = [32, 16], strides = [1, 1]} : vector<32x128xbf16> to vector<32x16xbf16>
    %42 = vector.shape_cast %34 : vector<32x16xbf16> to vector<1x32x16xbf16>
    %43 = vector.shape_cast %35 : vector<32x16xbf16> to vector<1x32x16xbf16>
    %44 = vector.shape_cast %36 : vector<32x16xbf16> to vector<1x32x16xbf16>
    %45 = vector.shape_cast %37 : vector<32x16xbf16> to vector<1x32x16xbf16>
    %46 = vector.shape_cast %38 : vector<32x16xbf16> to vector<1x32x16xbf16>
    %47 = vector.shape_cast %39 : vector<32x16xbf16> to vector<1x32x16xbf16>
    %48 = vector.shape_cast %40 : vector<32x16xbf16> to vector<1x32x16xbf16>
    %49 = vector.shape_cast %41 : vector<32x16xbf16> to vector<1x32x16xbf16>
    %50 = tpu.concatenate %42, %43, %44, %45, %46, %47, %48, %49 in 0 : vector<1x32x16xbf16>, vector<1x32x16xbf16>, vector<1x32x16xbf16>, vector<1x32x16xbf16>, vector<1x32x16xbf16>, vector<1x32x16xbf16>, vector<1x32x16xbf16>, vector<1x32x16xbf16> -> vector<8x32x16xbf16>
    %51 = vector.shape_cast %50 : vector<8x32x16xbf16> to vector<16x16x16xbf16>
    %52 = vector.extract_strided_slice %32 {offsets = [0, 128], sizes = [32, 128], strides = [1, 1]} : vector<32x384xbf16> to vector<32x128xbf16>
    %53 = vector.extract_strided_slice %52 {offsets = [0, 0], sizes = [32, 16], strides = [1, 1]} : vector<32x128xbf16> to vector<32x16xbf16>
    %54 = vector.extract_strided_slice %52 {offsets = [0, 16], sizes = [32, 16], strides = [1, 1]} : vector<32x128xbf16> to vector<32x16xbf16>
    %55 = vector.extract_strided_slice %52 {offsets = [0, 32], sizes = [32, 16], strides = [1, 1]} : vector<32x128xbf16> to vector<32x16xbf16>
    %56 = vector.extract_strided_slice %52 {offsets = [0, 48], sizes = [32, 16], strides = [1, 1]} : vector<32x128xbf16> to vector<32x16xbf16>
    %57 = vector.extract_strided_slice %52 {offsets = [0, 64], sizes = [32, 16], strides = [1, 1]} : vector<32x128xbf16> to vector<32x16xbf16>
    %58 = vector.extract_strided_slice %52 {offsets = [0, 80], sizes = [32, 16], strides = [1, 1]} : vector<32x128xbf16> to vector<32x16xbf16>
    %59 = vector.extract_strided_slice %52 {offsets = [0, 96], sizes = [32, 16], strides = [1, 1]} : vector<32x128xbf16> to vector<32x16xbf16>
    %60 = vector.extract_strided_slice %52 {offsets = [0, 112], sizes = [32, 16], strides = [1, 1]} : vector<32x128xbf16> to vector<32x16xbf16>
    %61 = vector.shape_cast %53 : vector<32x16xbf16> to vector<1x32x16xbf16>
    %62 = vector.shape_cast %54 : vector<32x16xbf16> to vector<1x32x16xbf16>
    %63 = vector.shape_cast %55 : vector<32x16xbf16> to vector<1x32x16xbf16>
    %64 = vector.shape_cast %56 : vector<32x16xbf16> to vector<1x32x16xbf16>
    %65 = vector.shape_cast %57 : vector<32x16xbf16> to vector<1x32x16xbf16>
    %66 = vector.shape_cast %58 : vector<32x16xbf16> to vector<1x32x16xbf16>
    %67 = vector.shape_cast %59 : vector<32x16xbf16> to vector<1x32x16xbf16>
    %68 = vector.shape_cast %60 : vector<32x16xbf16> to vector<1x32x16xbf16>
    %69 = tpu.concatenate %61, %62, %63, %64, %65, %66, %67, %68 in 0 : vector<1x32x16xbf16>, vector<1x32x16xbf16>, vector<1x32x16xbf16>, vector<1x32x16xbf16>, vector<1x32x16xbf16>, vector<1x32x16xbf16>, vector<1x32x16xbf16>, vector<1x32x16xbf16> -> vector<8x32x16xbf16>
    %70 = vector.shape_cast %69 : vector<8x32x16xbf16> to vector<16x16x16xbf16>
    %71 = vector.extract_strided_slice %32 {offsets = [0, 256], sizes = [32, 128], strides = [1, 1]} : vector<32x384xbf16> to vector<32x128xbf16>
    %72 = vector.extract_strided_slice %71 {offsets = [0, 0], sizes = [32, 16], strides = [1, 1]} : vector<32x128xbf16> to vector<32x16xbf16>
    %73 = vector.extract_strided_slice %71 {offsets = [0, 16], sizes = [32, 16], strides = [1, 1]} : vector<32x128xbf16> to vector<32x16xbf16>
    %74 = vector.extract_strided_slice %71 {offsets = [0, 32], sizes = [32, 16], strides = [1, 1]} : vector<32x128xbf16> to vector<32x16xbf16>
    %75 = vector.extract_strided_slice %71 {offsets = [0, 48], sizes = [32, 16], strides = [1, 1]} : vector<32x128xbf16> to vector<32x16xbf16>
    %76 = vector.extract_strided_slice %71 {offsets = [0, 64], sizes = [32, 16], strides = [1, 1]} : vector<32x128xbf16> to vector<32x16xbf16>
    %77 = vector.extract_strided_slice %71 {offsets = [0, 80], sizes = [32, 16], strides = [1, 1]} : vector<32x128xbf16> to vector<32x16xbf16>
    %78 = vector.extract_strided_slice %71 {offsets = [0, 96], sizes = [32, 16], strides = [1, 1]} : vector<32x128xbf16> to vector<32x16xbf16>
    %79 = vector.extract_strided_slice %71 {offsets = [0, 112], sizes = [32, 16], strides = [1, 1]} : vector<32x128xbf16> to vector<32x16xbf16>
    %80 = vector.shape_cast %72 : vector<32x16xbf16> to vector<1x32x16xbf16>
    %81 = vector.shape_cast %73 : vector<32x16xbf16> to vector<1x32x16xbf16>
    %82 = vector.shape_cast %74 : vector<32x16xbf16> to vector<1x32x16xbf16>
    %83 = vector.shape_cast %75 : vector<32x16xbf16> to vector<1x32x16xbf16>
    %84 = vector.shape_cast %76 : vector<32x16xbf16> to vector<1x32x16xbf16>
    %85 = vector.shape_cast %77 : vector<32x16xbf16> to vector<1x32x16xbf16>
    %86 = vector.shape_cast %78 : vector<32x16xbf16> to vector<1x32x16xbf16>
    %87 = vector.shape_cast %79 : vector<32x16xbf16> to vector<1x32x16xbf16>
    %88 = tpu.concatenate %80, %81, %82, %83, %84, %85, %86, %87 in 0 : vector<1x32x16xbf16>, vector<1x32x16xbf16>, vector<1x32x16xbf16>, vector<1x32x16xbf16>, vector<1x32x16xbf16>, vector<1x32x16xbf16>, vector<1x32x16xbf16>, vector<1x32x16xbf16> -> vector<8x32x16xbf16>
    %89 = vector.shape_cast %88 : vector<8x32x16xbf16> to vector<16x16x16xbf16>
    "tpu.trace_start"() <{level = 10 : i32, message = "zid,zjd->zij"}> : () -> ()
    %cst_15 = arith.constant dense<0.000000e+00> : vector<16x16x16xf32>
    %90 = tpu.matmul %51, %70, %cst_15 {dimension_numbers = #tpu.dot_dimension_numbers<[2], [2], [1], [1], [0, 0, 0, 1, 1, 1], [0], [0]>} : vector<16x16x16xbf16>, vector<16x16x16xbf16>, vector<16x16x16xf32> -> vector<16x16x16xf32>
    "tpu.trace_stop"() : () -> ()
    %cst_16 = arith.constant dense<0xFF800000> : vector<16x16xf32>
    %91 = vector.multi_reduction <maximumf>, %90, %cst_16 [2] : vector<16x16x16xf32> to vector<16x16xf32>
    %92 = vector.shape_cast %91 : vector<16x16xf32> to vector<16x16x1xf32>
    %93 = vector.broadcast %92 : vector<16x16x1xf32> to vector<16x16x16xf32>
    %94 = arith.subf %90, %93 : vector<16x16x16xf32>
    %95 = math.exp %94 : vector<16x16x16xf32>
    %cst_17 = arith.constant dense<0.000000e+00> : vector<16x16xf32>
    %96 = vector.multi_reduction <add>, %95, %cst_17 [2] : vector<16x16x16xf32> to vector<16x16xf32>
    %97 = vector.shape_cast %96 : vector<16x16xf32> to vector<16x16x1xf32>
    %98 = vector.broadcast %97 : vector<16x16x1xf32> to vector<16x16x16xf32>
    %99 = arith.divf %95, %98 : vector<16x16x16xf32>
    %100 = arith.truncf %99 : vector<16x16x16xf32> to vector<16x16x16xbf16>
    "tpu.trace_start"() <{level = 10 : i32, message = "zij,zjd->zid"}> : () -> ()
    %cst_18 = arith.constant dense<0.000000e+00> : vector<16x16x16xf32>
    %101 = tpu.matmul %100, %89, %cst_18 {dimension_numbers = #tpu.dot_dimension_numbers<[2], [1], [1], [2], [0, 0, 0, 1, 1, 2], [0], [0]>} : vector<16x16x16xbf16>, vector<16x16x16xbf16>, vector<16x16x16xf32> -> vector<16x16x16xf32>
    "tpu.trace_stop"() : () -> ()
    %102 = vector.shape_cast %101 : vector<16x16x16xf32> to vector<8x32x16xf32>
    %103 = arith.truncf %102 : vector<8x32x16xf32> to vector<8x32x16xbf16>
    %c0_19 = arith.constant 0 : index
    %c0_20 = arith.constant 0 : index
    %c0_21 = arith.constant 0 : index
    %104 = vector.load %arg6[%c0_19, %c0_20, %c0_21] : memref<8x16x128xbf16, #tpu.memory_space<vmem>>, vector<8x16x128xbf16>
    "tpu.trace_start"() <{level = 10 : i32, message = "htd,hde->hte"}> : () -> ()
    %cst_22 = arith.constant dense<0.000000e+00> : vector<8x32x128xf32>
    %105 = tpu.matmul %103, %104, %cst_22 {dimension_numbers = #tpu.dot_dimension_numbers<[2], [1], [1], [2], [0, 0, 0, 1, 1, 2], [0], [0]>} : vector<8x32x16xbf16>, vector<8x16x128xbf16>, vector<8x32x128xf32> -> vector<8x32x128xf32>
    "tpu.trace_stop"() : () -> ()
    %cst_23 = arith.constant dense<0.000000e+00> : vector<32x128xf32>
    %106 = vector.multi_reduction <add>, %105, %cst_23 [0] : vector<8x32x128xf32> to vector<32x128xf32>
    %c0_24 = arith.constant 0 : index
    %c0_25 = arith.constant 0 : index
    %107 = vector.load %arg7[%c0_24, %c0_25] : memref<1x128xf32, #tpu.memory_space<vmem>>, vector<1x128xf32>
    %108 = vector.broadcast %107 : vector<1x128xf32> to vector<32x128xf32>
    %109 = arith.addf %106, %108 : vector<32x128xf32>
    %110 = arith.addf %1, %109 : vector<32x128xf32>
    %cst_26 = arith.constant dense<0.000000e+00> : vector<32xf32>
    %111 = vector.multi_reduction <add>, %110, %cst_26 [1] : vector<32x128xf32> to vector<32xf32>
    %112 = vector.shape_cast %111 : vector<32xf32> to vector<32x1xf32>
    %cst_27 = arith.constant 1.280000e+02 : f32
    %113 = vector.broadcast %cst_27 : f32 to vector<32x1xf32>
    %114 = arith.divf %112, %113 : vector<32x1xf32>
    %115 = vector.broadcast %114 : vector<32x1xf32> to vector<32x128xf32>
    %116 = arith.subf %110, %115 : vector<32x128xf32>
    %117 = arith.mulf %116, %116 : vector<32x128xf32>
    %cst_28 = arith.constant dense<0.000000e+00> : vector<32xf32>
    %118 = vector.multi_reduction <add>, %117, %cst_28 [1] : vector<32x128xf32> to vector<32xf32>
    %119 = vector.shape_cast %118 : vector<32xf32> to vector<32x1xf32>
    %cst_29 = arith.constant 1.280000e+02 : f32
    %120 = vector.broadcast %cst_29 : f32 to vector<32x1xf32>
    %121 = arith.divf %119, %120 : vector<32x1xf32>
    %122 = vector.broadcast %114 : vector<32x1xf32> to vector<32x128xf32>
    %123 = arith.subf %110, %122 : vector<32x128xf32>
    %cst_30 = arith.constant 9.99999974E-6 : f32
    %124 = vector.broadcast %cst_30 : f32 to vector<32x1xf32>
    %125 = arith.addf %121, %124 : vector<32x1xf32>
    %126 = math.rsqrt %125 : vector<32x1xf32>
    %127 = vector.broadcast %126 : vector<32x1xf32> to vector<32x128xf32>
    %128 = arith.mulf %123, %127 : vector<32x128xf32>
    %129 = vector.broadcast %2 : vector<1x128xf32> to vector<32x128xf32>
    %130 = arith.mulf %128, %129 : vector<32x128xf32>
    %131 = vector.broadcast %3 : vector<1x128xf32> to vector<32x128xf32>
    %132 = arith.addf %130, %131 : vector<32x128xf32>
    %133 = arith.truncf %132 : vector<32x128xf32> to vector<32x128xbf16>
    %c0_31 = arith.constant 0 : index
    %c0_32 = arith.constant 0 : index
    %134 = vector.load %arg8[%c0_31, %c0_32] : memref<128x512xbf16, #tpu.memory_space<vmem>>, vector<128x512xbf16>
    %cst_33 = arith.constant dense<0.000000e+00> : vector<32x512xf32>
    %135 = tpu.matmul %133, %134, %cst_33 {dimension_numbers = #tpu.dot_dimension_numbers<[1], [0], [0], [1], [0, 0, 1, 1], [], []>} : vector<32x128xbf16>, vector<128x512xbf16>, vector<32x512xf32> -> vector<32x512xf32>
    %c0_34 = arith.constant 0 : index
    %c0_35 = arith.constant 0 : index
    %136 = vector.load %arg9[%c0_34, %c0_35] : memref<1x512xf32, #tpu.memory_space<vmem>>, vector<1x512xf32>
    %137 = vector.broadcast %136 : vector<1x512xf32> to vector<32x512xf32>
    %138 = arith.addf %135, %137 : vector<32x512xf32>
    %cst_36 = arith.constant 5.000000e-01 : f32
    %139 = vector.broadcast %cst_36 : f32 to vector<32x512xf32>
    %140 = arith.mulf %139, %138 : vector<32x512xf32>
    %cst_37 = arith.constant 0.707106769 : f32
    %141 = vector.broadcast %cst_37 : f32 to vector<32x512xf32>
    %142 = arith.mulf %138, %141 : vector<32x512xf32>
    %143 = math.erf %142 : vector<32x512xf32>
    %cst_38 = arith.constant 1.000000e+00 : f32
    %144 = vector.broadcast %cst_38 : f32 to vector<32x512xf32>
    %145 = arith.addf %144, %143 : vector<32x512xf32>
    %146 = arith.mulf %140, %145 : vector<32x512xf32>
    %147 = arith.truncf %146 : vector<32x512xf32> to vector<32x512xbf16>
    %c0_39 = arith.constant 0 : index
    %c0_40 = arith.constant 0 : index
    %148 = vector.load %arg10[%c0_39, %c0_40] : memref<512x128xbf16, #tpu.memory_space<vmem>>, vector<512x128xbf16>
    %cst_41 = arith.constant dense<0.000000e+00> : vector<32x128xf32>
    %149 = tpu.matmul %147, %148, %cst_41 {dimension_numbers = #tpu.dot_dimension_numbers<[1], [0], [0], [1], [0, 0, 1, 1], [], []>} : vector<32x512xbf16>, vector<512x128xbf16>, vector<32x128xf32> -> vector<32x128xf32>
    %c0_42 = arith.constant 0 : index
    %c0_43 = arith.constant 0 : index
    %150 = vector.load %arg11[%c0_42, %c0_43] : memref<1x128xf32, #tpu.memory_space<vmem>>, vector<1x128xf32>
    %151 = vector.broadcast %150 : vector<1x128xf32> to vector<32x128xf32>
    %152 = arith.addf %149, %151 : vector<32x128xf32>
    %153 = arith.addf %110, %152 : vector<32x128xf32>
    %154 = vector.shape_cast %153 : vector<32x128xf32> to vector<2x16x128xf32>
    %c0_44 = arith.constant 0 : index
    %c0_45 = arith.constant 0 : index
    %c0_46 = arith.constant 0 : index
    %155 = vector.load %arg12[%c0_44, %c0_45, %c0_46] : memref<2x16x128xf32, #tpu.memory_space<vmem>>, vector<2x16x128xf32>
    tpu.vector_store %arg12[%c0_44, %c0_45, %c0_46], %154 {strides = array<i32>} : memref<2x16x128xf32, #tpu.memory_space<vmem>>, vector<2x16x128xf32>,
    return
  }
  func.func @transform_0(%arg0: i32) -> (i32, i32, i32) {
    %c0_i32 = arith.constant 0 : i32
    %c0_i32_0 = arith.constant 0 : i32
    %c0_i32_1 = arith.constant 0 : i32
    return %arg0, %c0_i32, %c0_i32_0 : i32, i32, i32
  }
  func.func @transform_1(%arg0: i32) -> (i32, i32) {
    %c0_i32 = arith.constant 0 : i32
    %c0_i32_0 = arith.constant 0 : i32
    %c0_i32_1 = arith.constant 0 : i32
    return %c0_i32, %c0_i32_0 : i32, i32
  }
  func.func @transform_2(%arg0: i32) -> (i32, i32) {
    %c0_i32 = arith.constant 0 : i32
    %c0_i32_0 = arith.constant 0 : i32
    %c0_i32_1 = arith.constant 0 : i32
    return %c0_i32, %c0_i32_0 : i32, i32
  }
  func.func @transform_3(%arg0: i32) -> (i32, i32) {
    %c0_i32 = arith.constant 0 : i32
    %c0_i32_0 = arith.constant 0 : i32
    %c0_i32_1 = arith.constant 0 : i32
    return %c0_i32, %c0_i32_0 : i32, i32
  }
  func.func @transform_4(%arg0: i32) -> (i32, i32) {
    %c0_i32 = arith.constant 0 : i32
    %c0_i32_0 = arith.constant 0 : i32
    %c0_i32_1 = arith.constant 0 : i32
    return %c0_i32, %c0_i32_0 : i32, i32
  }
  func.func @transform_5(%arg0: i32) -> (i32, i32, i32) {
    %c0_i32 = arith.constant 0 : i32
    %c0_i32_0 = arith.constant 0 : i32
    %c0_i32_1 = arith.constant 0 : i32
    %c0_i32_2 = arith.constant 0 : i32
    return %c0_i32, %c0_i32_0, %c0_i32_1 : i32, i32, i32
  }
  func.func @transform_6(%arg0: i32) -> (i32, i32) {
    %c0_i32 = arith.constant 0 : i32
    %c0_i32_0 = arith.constant 0 : i32
    %c0_i32_1 = arith.constant 0 : i32
    return %c0_i32, %c0_i32_0 : i32, i32
  }
  func.func @transform_7(%arg0: i32) -> (i32, i32) {
    %c0_i32 = arith.constant 0 : i32
    %c0_i32_0 = arith.constant 0 : i32
    %c0_i32_1 = arith.constant 0 : i32
    return %c0_i32, %c0_i32_0 : i32, i32
  }
  func.func @transform_8(%arg0: i32) -> (i32, i32) {
    %c0_i32 = arith.constant 0 : i32
    %c0_i32_0 = arith.constant 0 : i32
    %c0_i32_1 = arith.constant 0 : i32
    return %c0_i32, %c0_i32_0 : i32, i32
  }
  func.func @transform_9(%arg0: i32) -> (i32, i32) {
    %c0_i32 = arith.constant 0 : i32
    %c0_i32_0 = arith.constant 0 : i32
    %c0_i32_1 = arith.constant 0 : i32
    return %c0_i32, %c0_i32_0 : i32, i32
  }
  func.func @transform_10(%arg0: i32) -> (i32, i32) {
    %c0_i32 = arith.constant 0 : i32
    %c0_i32_0 = arith.constant 0 : i32
    %c0_i32_1 = arith.constant 0 : i32
    return %c0_i32, %c0_i32_0 : i32, i32
  }
  func.func @transform_11(%arg0: i32) -> (i32, i32, i32) {
    %c0_i32 = arith.constant 0 : i32
    %c0_i32_0 = arith.constant 0 : i32
    %c0_i32_1 = arith.constant 0 : i32
    return %arg0, %c0_i32, %c0_i32_0 : i32, i32, i32
  }
}

</mosaic_0001>

<bundles_post_ra>
// kernel: transformer_block.1
= control target key start
LH: loop header
LB: loop body
LE: loop exit
PB: predicated region body
PF: predicated region fallthrough
CT: control target
= control target key end

     0   :  { %16 = vsyncpa [#allocation3], 0  ;;  %s5782_s0 = inlined_call_operand.hbm [shape: f32[2,16,128], index: 0, kind: input, shape index: {}]   ;;  %s5783_s1 = inlined_call_operand.vmem [shape: f32[1,128], index: 1, kind: input, shape index: {}]   ;;  %s5784_s2 = inlined_call_operand.vmem [shape: f32[1,128], index: 2, kind: input, shape index: {}]   ;;  %s5785_s3 = inlined_call_operand.hbm [shape: bf16[128,384], index: 3, kind: input, shape index: {}]   ;;  %s5786_s4 = inlined_call_operand.vmem [shape: f32[1,384], index: 4, kind: input, shape index: {}]   ;;  %s5787_s5 = inlined_call_operand.hbm [shape: bf16[8,16,128], index: 5, kind: input, shape index: {}]   ;;  %s5788_s6 = inlined_call_operand.vmem [shape: f32[1,128], index: 6, kind: input, shape index: {}]   ;;  %s5789_s7 = inlined_call_operand.hbm [shape: bf16[128,512], index: 7, kind: input, shape index: {}]   ;;  %s5790_s8 = inlined_call_operand.hbm [shape: f32[1,512], index: 8, kind: input, shape index: {}]   ;;  %s5791_s9 = inlined_call_operand.hbm [shape: bf16[512,128], index: 9, kind: input, shape index: {}]   ;;  %s5792_s10 = inlined_call_operand.vmem [shape: f32[1,128], index: 10, kind: input, shape index: {}]   ;;  %s5793_s11 = inlined_call_operand.hbm [shape: f32[2,16,128], index: 11, kind: output, shape index: {}]  }
   0x1   :  { %17 = vsyncpa [#allocation6], 0 }
   0x2   :  { %18 = vsyncpa [#allocation9], 0 }
   0x3   :  { %19 = vsyncpa [#allocation12], 0 }
   0x4   :  { %20 = vsyncpa [#allocation4], 0  ;;  %s4900_s17 = smov [#allocation5]   ;;  %s4736_s21 = scalar_lea.hbm %s5785_s3, 3072 }
   0x5   :  { %s42_s18 = sshll.u32 %s4900_s17, 4  ;;  %p4737_p0 = scmp.ne.s32.totalorder %s5785_s3, %s4736_s21  ;;  %s43_s18 = int_to_ptr.vmem [resolvable:$true] %s42_s18 }
   0x6   :  { %p4740_p1 = scmp.lt.u32.totalorder %s4736_s21, %s5785_s3 }
   0x8   :  { %p4742_p2 = pnand %p4740_p1, %p4737_p0 }
   0xa   :  { %4745 = shalt.err (!%p4742_p2)
}
   0xb   :  { %s4746_s26 = scalar_lea.vmem %s43_s18, 3072  ;;  %p4751_p4 = scmp.lt.s32.totalorder %s43_s18, %s43_s18 }
   0xc   :  { %p4747_p3 = scmp.ne.s32.totalorder %s43_s18, %s4746_s26  ;;  %p4752_p5 = scmp.lt.s32.totalorder %s4746_s26, %s4746_s26 }
   0xe   :  { %p4753_p6 = por %p4752_p5, %p4751_p4 }
  0x10   :  { %p4754_p7 = pnand %p4753_p6, %p4747_p3 }
  0x12   :  { %4757 = shalt.err (!%p4754_p7)
}
  0x13   :  { %s4901_s27 = smov 192   ;;  %s4902_s28 = smov 12  }
  0x14   :  { %48 = dma.hbm_to_vmem [thread:$0]  %s5785_s3, 3072, %s43_s18, [#allocation6], %s4901_s27, %s4901_s27, %s4902_s28  }
  0x15   :  { %s4903_s12 = smov [#allocation8]   ;;  %s4758_s16 = scalar_lea.hbm %s5789_s7, 4096 }
  0x16   :  { %s70_s13 = sshll.u32 %s4903_s12, 4  ;;  %p4759_p8 = scmp.ne.s32.totalorder %s5789_s7, %s4758_s16  ;;  %s71_s13 = int_to_ptr.vmem [resolvable:$true] %s70_s13 }
  0x17   :  { %p4762_p9 = scmp.lt.u32.totalorder %s4758_s16, %s5789_s7 }
  0x19   :  { %p4764_p10 = pnand %p4762_p9, %p4759_p8 }
  0x1b   :  { %4767 = shalt.err (!%p4764_p10)
}
  0x1c   :  { %s4768_s22 = scalar_lea.vmem %s71_s13, 4096  ;;  %p4773_p12 = scmp.lt.s32.totalorder %s71_s13, %s71_s13 }
  0x1d   :  { %p4769_p11 = scmp.ne.s32.totalorder %s71_s13, %s4768_s22  ;;  %p4774_p13 = scmp.lt.s32.totalorder %s4768_s22, %s4768_s22 }
  0x1f   :  { %p4775_p0 = por %p4774_p13, %p4773_p12 }
  0x21   :  { %p4776_p1 = pnand %p4775_p0, %p4769_p11 }
  0x23   :  { %4779 = shalt.err (!%p4776_p1)
}
  0x24   :  { %s4904_s3 = smov 256   ;;  %s4905_s18 = smov 16  }
  0x25   :  { %76 = dma.hbm_to_vmem [thread:$0]  %s5789_s7, 4096, %s71_s13, [#allocation9], %s4904_s3, %s4904_s3, %s4905_s18  }
  0x26   :  { %s4906_s25 = smov [#allocation2]   ;;  %s4780_s29 = scalar_lea.hbm %s5782_s0, 512 }
  0x27   :  { %s26_s26 = sshll.u32 %s4906_s25, 4  ;;  %p4781_p2 = scmp.ne.s32.totalorder %s5782_s0, %s4780_s29  ;;  %s27_s26 = int_to_ptr.vmem [resolvable:$true] %s26_s26 }
  0x28   :  { %p4784_p3 = scmp.lt.u32.totalorder %s4780_s29, %s5782_s0 }
  0x2a   :  { %p4786_p4 = pnand %p4784_p3, %p4781_p2 }
  0x2c   :  { %4789 = shalt.err (!%p4786_p4)
}
  0x2d   :  { %s4790_s16 = scalar_lea.vmem %s27_s26, 512  ;;  %p4795_p6 = scmp.lt.s32.totalorder %s27_s26, %s27_s26 }
  0x2e   :  { %p4791_p5 = scmp.ne.s32.totalorder %s27_s26, %s4790_s16  ;;  %p4796_p7 = scmp.lt.s32.totalorder %s4790_s16, %s4790_s16 }
  0x30   :  { %p4797_p8 = por %p4796_p7, %p4795_p6 }
  0x32   :  { %p4798_p9 = pnand %p4797_p8, %p4791_p5 }
  0x34   :  { %4801 = shalt.err (!%p4798_p9)
}
  0x35   :  { %s4907_s7 = smov 128   ;;  %s4908_s13 = smov 8  }
  0x36   :  { %32 = dma.hbm_to_vmem [thread:$0]  %s5782_s0, 512, %s27_s26, [#allocation3], %s4907_s7, %s4907_s7, %s4908_s13  }
  0x37   :  { %s4909_s20 = smov [#allocation7]   ;;  %s4802_s23 = scalar_lea.hbm %s5787_s5, 1024 }
  0x38   :  { %s56_s21 = sshll.u32 %s4909_s20, 4  ;;  %p4803_p10 = scmp.ne.s32.totalorder %s5787_s5, %s4802_s23  ;;  %s57_s21 = int_to_ptr.vmem [resolvable:$true] %s56_s21 }
  0x39   :  { %p4806_p11 = scmp.lt.u32.totalorder %s4802_s23, %s5787_s5 }
  0x3b   :  { %p4808_p12 = pnand %p4806_p11, %p4803_p10 }
  0x3d   :  { %4811 = shalt.err (!%p4808_p12)
}
  0x3e   :  { %s4812_s29 = scalar_lea.vmem %s57_s21, 1024  ;;  %p4817_p0 = scmp.lt.s32.totalorder %s57_s21, %s57_s21 }
  0x3f   :  { %p4813_p13 = scmp.ne.s32.totalorder %s57_s21, %s4812_s29  ;;  %p4818_p1 = scmp.lt.s32.totalorder %s4812_s29, %s4812_s29 }
  0x41   :  { %p4819_p2 = por %p4818_p1, %p4817_p0 }
  0x43   :  { %p4820_p3 = pnand %p4819_p2, %p4813_p13 }
  0x45   :  { %4823 = shalt.err (!%p4820_p3)
}
  0x46   :  { %s4910_s0 = smov 64   ;;  %s4911_s26 = smov 4  }
  0x47   :  { %62 = dma.hbm_to_vmem [thread:$0]  %s5787_s5, 1024, %s57_s21, [#allocation6], %s4910_s0, %s4910_s0, %s4911_s26  }
  0x48   :  { %s4912_s14 = smov [#allocation10]   ;;  %s4913_s16 = smov [#allocation11]  }
  0x49   :  { %s83_s15 = sshll.u32 %s4912_s14, 4  ;;  %s92_s17 = sshll.u32 %s4913_s16, 4  ;;  %s84_s15 = int_to_ptr.vmem [resolvable:$true] %s83_s15  ;;  %s5038_s17 = int_to_ptr.vmem [resolvable:$true] %s92_s17 }
  0x4a   :  { %s4824_s22 = scalar_lea.hbm %s5790_s8, 64 }
  0x4b   :  { %p4825_p4 = scmp.ne.s32.totalorder %s5790_s8, %s4824_s22  ;;  %p4828_p5 = scmp.lt.u32.totalorder %s4824_s22, %s5790_s8 }
  0x4d   :  { %p4830_p6 = pnand %p4828_p5, %p4825_p4 }
  0x4f   :  { %4833 = shalt.err (!%p4830_p6)
}
  0x50   :  { %s4834_s5 = scalar_lea.vmem %s84_s15, 64  ;;  %p4839_p8 = scmp.lt.s32.totalorder %s84_s15, %s84_s15 }
  0x51   :  { %p4835_p7 = scmp.ne.s32.totalorder %s84_s15, %s4834_s5  ;;  %p4840_p9 = scmp.lt.s32.totalorder %s4834_s5, %s4834_s5 }
  0x53   :  { %p4841_p10 = por %p4840_p9, %p4839_p8 }
  0x55   :  { %p4842_p11 = pnand %p4841_p10, %p4835_p7 }
  0x57   :  { %4845 = shalt.err (!%p4842_p11)
}
  0x58   :  { %86 = dma.hbm_to_vmem [thread:$0]  %s5790_s8, 64, %s84_s15, [#allocation9]  }
  0x59   :  { %s4846_s30 = scalar_lea.hbm %s5791_s9, 4096 }
  0x5a   :  { %p4847_p12 = scmp.ne.s32.totalorder %s5791_s9, %s4846_s30  ;;  %p4850_p13 = scmp.lt.u32.totalorder %s4846_s30, %s5791_s9 }
  0x5c   :  { %p4852_p0 = pnand %p4850_p13, %p4847_p12 }
  0x5e   :  { %4855 = shalt.err (!%p4852_p0)
}
  0x5f   :  { %s4856_s20 = scalar_lea.vmem %s5038_s17, 4096  ;;  %p4861_p2 = scmp.lt.s32.totalorder %s5038_s17, %s5038_s17 }
  0x60   :  { %p4857_p1 = scmp.ne.s32.totalorder %s5038_s17, %s4856_s20  ;;  %p4862_p3 = scmp.lt.s32.totalorder %s4856_s20, %s4856_s20 }
  0x62   :  { %p4863_p4 = por %p4862_p3, %p4861_p2 }
  0x64   :  { %p4864_p5 = pnand %p4863_p4, %p4857_p1 }
  0x66   :  { %4867 = shalt.err (!%p4864_p5)
}
  0x67   :  { %98 = dma.hbm_to_vmem [thread:$0]  %s5791_s9, 4096, %s5038_s17, [#allocation12], %s4910_s0, %s4910_s0, %s4911_s26  }
  0x68   :  { %4890 = dma.done.wait [#allocation3], 512  }
  0x69   :  { %4891 = vsyncadd [#allocation3], 4294966784 }
  0x6a   :  { %4892 = dma.done.wait [#allocation6], 4096  }
  0x6b   :  { %4893 = vsyncadd [#allocation6], 4294963200 }
  0x6c   :  { %4894 = dma.done.wait [#allocation9], 4160  }
  0x6d   :  { %4895 = vsyncadd [#allocation9], 4294963136 }
  0x6e   :  { %4896 = dma.done.wait [#allocation12], 4096  }
  0x6f   :  { %4897 = vsyncadd [#allocation12], 4294963200  ;;  %v120_v0 = vld [vmem:[#allocation2] sm:$0xff]  ;;  %v122_v1 = vld [vmem:[#allocation2 + $0x10] sm:$0xff]  ;;  %v4914_v39 = vmov 0   ;;  %vm4916_vm0 = vmmov 0  }
  0x70   :  { %v121_v2 = vld [vmem:[#allocation2 + $0x8] sm:$0xff]  ;;  %126 = vadd.xlane.f32.xlu0 %v120_v0  ;;  %130 = vadd.xlane.f32.xlu1 %v122_v1  ;;  %v123_v3 = vld [vmem:[#allocation2 + $0x18] sm:$0xff]  ;;  %v4434_v4 = vld [vmem:[#allocation5 + $0x4] ss:$12 sps:$4 sm:$0xff]   ;;  %vm582_vm1 = vcmask 130048   ;;  %s4918_s24 = smov 96  }
  0x71   :  { %v4436_v5 = vld [vmem:[#allocation5] ss:$12 sps:$4 sm:$0xff]   ;;  %v4437_v6 = vld [vmem:[#allocation5 + $0x1c] ss:$12 sps:$4 sm:$0xff]   ;;  %370 = vmatprep.subr.bf16.mxu0 %v4434_v4  ;;  %v4440_v24 = vld [vmem:[#allocation5 + $0x18] ss:$12 sps:$4 sm:$0xff]   ;;  %402 = vmatprep.mubr.bf16.mxu0 %v4914_v39 }
  0x72   :  { %v4439_v7 = vld [vmem:[#allocation5 + $0x8] ss:$12 sps:$4 sm:$0xff]   ;;  %371 = vmatpush1.bf16.msra.mxu0 %v4436_v5  ;;  %v4443_v26 = vld [vmem:[#allocation5 + $0x20] ss:$12 sps:$4 sm:$0xff]   ;;  %v4444_v27 = vld [vmem:[#allocation5 + $0x30] ss:$12 sps:$4 sm:$0xff]  }
  0x73   :  { %4123 = vmatprep.subr.bf16.mxu1 %v4439_v7  ;;  %372 = vmatprep.subr.bf16.mxu0 %v4437_v6  ;;  %v4441_v25 = vld [vmem:[#allocation5 + $0x34] ss:$12 sps:$4 sm:$0xff]   ;;  %v4445_v28 = vld [vmem:[#allocation5 + $0x4c] ss:$12 sps:$4 sm:$0xff]   ;;  %v4449_v31 = vld [vmem:[#allocation5 + $0x64] ss:$12 sps:$4 sm:$0xff]  }
  0x74   :  { %128 = vadd.xlane.f32.xlu0 %v121_v2  ;;  %132 = vadd.xlane.f32.xlu1 %v123_v3  ;;  %v4447_v29 = vld [vmem:[#allocation5 + $0x38] ss:$12 sps:$4 sm:$0xff]   ;;  %v4448_v30 = vld [vmem:[#allocation5 + $0x48] ss:$12 sps:$4 sm:$0xff]   ;;  %v4451_v32 = vld [vmem:[#allocation5 + $0x50] ss:$12 sps:$4 sm:$0xff]  }
  0x75   :  { %4124 = vmatpush3.bf16.msra.mxu1 %v4439_v7  ;;  %v4452_v33 = vld [vmem:[#allocation5 + $0x60] ss:$12 sps:$4 sm:$0xff]   ;;  %v4453_v34 = vld [vmem:[#allocation5 + $0x7c] ss:$12 sps:$4 sm:$0xff]   ;;  %v4456_v36 = vld [vmem:[#allocation5 + $0x78] ss:$12 sps:$4 sm:$0xff]  }
  0x76   :  { %373 = vmatpush1.bf16.msra.mxu0 %v4440_v24  ;;  %4125 = vmatprep.subr.bf16.mxu1 %v4443_v26  ;;  %v4455_v35 = vld [vmem:[#allocation5 + $0x68] ss:$12 sps:$4 sm:$0xff]   ;;  %v4459_v38 = vld [vmem:[#allocation5 + $0x80] ss:$12 sps:$4 sm:$0xff]   ;;  %v4460_v40 = vld [vmem:[#allocation5 + $0x90] ss:$12 sps:$4 sm:$0xff]  }
  0x77   :  { %374 = vmatprep.subr.bf16.mxu0 %v4441_v25  ;;  %v4457_v37 = vld [vmem:[#allocation5 + $0x94] ss:$12 sps:$4 sm:$0xff]   ;;  %v4461_v41 = vld [vmem:[#allocation5 + $0xac] ss:$12 sps:$4 sm:$0xff]   ;;  %v4465_v44 = vld [vmem:[#allocation5 + $0xb0] ss:$12 sps:$4 sm:$0xff]  }
  0x78   :  { %v4463_v42 = vld [vmem:[#allocation5 + $0x98] ss:$12 sps:$4 sm:$0xff]   ;;  %v4464_v43 = vld [vmem:[#allocation5 + $0xa8] ss:$12 sps:$4 sm:$0xff]   ;;  %v3821_v59 = vld [vmem:[%s5783_s1] ss:$0 sm:$0xff] }
  0x79   :  { %4126 = vmatpush3.bf16.msra.mxu1 %v4443_v26  ;;  %s4919_s25 = smov 80   ;;  %s4920_s5 = smov 48  }
  0x7a   :  { %375 = vmatpush1.bf16.msra.mxu0 %v4444_v27  ;;  %4127 = vmatprep.subr.bf16.mxu1 %v4447_v29  ;;  %s4921_s21 = smov 32  }
  0x7b   :  { %376 = vmatprep.subr.bf16.mxu0 %v4445_v28 }
  0x7d   :  { %4128 = vmatpush3.bf16.msra.mxu1 %v4447_v29 }
  0x7e   :  { %377 = vmatpush1.bf16.msra.mxu0 %v4448_v30  ;;  %4129 = vmatprep.subr.bf16.mxu1 %v4451_v32 }
  0x7f   :  { %378 = vmatprep.subr.bf16.mxu0 %v4449_v31 }
  0x81   :  { %4130 = vmatpush3.bf16.msra.mxu1 %v4451_v32 }
  0x82   :  { %379 = vmatpush1.bf16.msra.mxu0 %v4452_v33  ;;  %4131 = vmatprep.subr.bf16.mxu1 %v4455_v35 }
  0x83   :  { %380 = vmatprep.subr.bf16.mxu0 %v4453_v34 }
  0x85   :  { %4132 = vmatpush3.bf16.msra.mxu1 %v4455_v35 }
  0x86   :  { %381 = vmatpush1.bf16.msra.mxu0 %v4456_v36  ;;  %4133 = vmatprep.subr.bf16.mxu1 %v4459_v38 }
  0x87   :  { %382 = vmatprep.subr.bf16.mxu0 %v4457_v37 }
  0x89   :  { %4134 = vmatpush3.bf16.msra.mxu1 %v4459_v38 }
  0x8a   :  { %383 = vmatpush1.bf16.msra.mxu0 %v4460_v40  ;;  %4135 = vmatprep.subr.bf16.mxu1 %v4463_v42 }
  0x8b   :  { %384 = vmatprep.subr.bf16.mxu0 %v4461_v41 }
  0x8d   :  { %4136 = vmatpush3.bf16.msra.mxu1 %v4463_v42 }
  0x8e   :  { %385 = vmatpush1.bf16.msra.mxu0 %v4464_v43  ;;  %4137 = vmatprep.subr.bf16.mxu1 %v4465_v44 }
  0x91   :  { %4138 = vmatpush3.bf16.msra.mxu1 %v4465_v44 }
  0xfd   :  { %v127_v8 = vpop.xlane.xlu0 %126  ;;  %v131_v9 = vpop.xlane.xlu1 %130 }
  0xfe   :  { %v135_v10 = vmul.f32 0.0078125, %v127_v8  ;;  %v137_v11 = vmul.f32 0.0078125, %v131_v9 }
 0x100   :  { %v5072_v12 = vsub.f32 %v120_v0, %v135_v10  ;;  %v5074_v13 = vsub.f32 %v122_v1, %v137_v11  ;;  %v3822_v0 = vld [vmem:[%s5784_s2] ss:$0 sm:$0xff] }
 0x101   :  { %v129_v14 = vpop.xlane.xlu0 %128  ;;  %v133_v15 = vpop.xlane.xlu1 %132 }
 0x102   :  { %v136_v16 = vmul.f32 0.0078125, %v129_v14  ;;  %v143_v17 = vmul.f32 %v5072_v12, %v5072_v12  ;;  %v138_v18 = vmul.f32 0.0078125, %v133_v15  ;;  %v145_v19 = vmul.f32 %v5074_v13, %v5074_v13 }
 0x103   :  { %v4915_v14 = vmov 0.0  }
 0x104   :  { %147 = vadd.xlane.f32.xlu0 %v143_v17  ;;  %v5080_v20 = vsub.f32 %v121_v2, %v136_v16  ;;  %v5082_v21 = vsub.f32 %v123_v3, %v138_v18  ;;  %4143 = vmatprep.subr.bf16.mxu1 %v4915_v14  ;;  %v225_v17 = vld [vmem:[%s5786_s4] sm:$0x7]  ;;  %s4917_s4 = smov 112  }
 0x105   :  { %4149 = vmatprep.subr.bf16.mxu0 %v4915_v14 }
 0x106   :  { %v144_v22 = vmul.f32 %v5080_v20, %v5080_v20  ;;  %v146_v23 = vmul.f32 %v5082_v21, %v5082_v21 }
 0x108   :  { %151 = vadd.xlane.f32.xlu0 %v145_v19  ;;  %149 = vadd.xlane.f32.xlu1 %v144_v22 }
 0x10c   :  { %153 = vadd.xlane.f32.xlu1 %v146_v23 }
 0x191   :  { %v148_v45 = vpop.xlane.xlu0 %147 }
 0x192   :  { %v155_v46 = vmul.f32 0.0078125, %v148_v45 }
 0x194   :  { %v159_v47 = vadd.f32 1e-05, %v155_v46 }
 0x195   :  { %v150_v48 = vpop.xlane.xlu1 %149  ;;  %v152_v49 = vpop.xlane.xlu0 %151 }
 0x196   :  { %4554 = vrsqrt.f32 %v159_v47  ;;  %v156_v50 = vmul.f32 0.0078125, %v150_v48  ;;  %v157_v51 = vmul.f32 0.0078125, %v152_v49 }
 0x198   :  { %v160_v52 = vadd.f32 1e-05, %v156_v50  ;;  %v161_v53 = vadd.f32 1e-05, %v157_v51 }
 0x199   :  { %v154_v54 = vpop.xlane.xlu1 %153 }
 0x19a   :  { %4556 = vrsqrt.f32 %v160_v52  ;;  %v158_v55 = vmul.f32 0.0078125, %v154_v54 }
 0x19b   :  { %4558 = vrsqrt.f32 %v161_v53 }
 0x19c   :  { %v162_v56 = vadd.f32 1e-05, %v158_v55 }
 0x19e   :  { %4560 = vrsqrt.f32 %v162_v56 }
 0x1a0   :  { %v4555_v57 = vpop.eup %4554 }
 0x1a1   :  { %v167_v58 = vmul.f32 %v4555_v57, %v5072_v12 }
 0x1a3   :  { %v177_v63 = vmul.f32 %v3821_v59, %v167_v58 }
 0x1a4   :  { %v4557_v60 = vpop.eup %4556 }
 0x1a5   :  { %v4559_v61 = vpop.eup %4558  ;;  %v168_v62 = vmul.f32 %v4557_v60, %v5080_v20  ;;  %v187_v4 = vadd.f32 %v3822_v0, %v177_v63 }
 0x1a6   :  { %v169_v1 = vmul.f32 %v4559_v61, %v5074_v13  ;;  %v227_v13 = vlaneseq }
 0x1a7   :  { %v178_v2 = vmul.f32 %v3821_v59, %v168_v62 }
 0x1a8   :  { %v4561_v3 = vpop.eup %4560  ;;  %v179_v7 = vmul.f32 %v3821_v59, %v169_v1  ;;  %v5106_v15 = vshrl.u32 %v227_v13, 7 }
 0x1a9   :  { %v188_v5 = vadd.f32 %v3822_v0, %v178_v2  ;;  %v170_v6 = vmul.f32 %v4561_v3, %v5082_v21 }
 0x1aa   :  { %v189_v10 = vadd.f32 %v3822_v0, %v179_v7  ;;  %v229_v16 = vsub.s32 0, %v5106_v15  ;;  %v5795_v18 = vsub.s32 1, %v5106_v15  ;;  %v5794_v20 = vsub.s32 2, %v5106_v15 }
 0x1ab   :  { %v191_v8 = vpack.c.bf16 %v188_v5, %v187_v4  ;;  %v180_v9 = vmul.f32 %v3821_v59, %v170_v6 }
 0x1ac   :  { %v230_v19 = vrot.slane %v225_v17, %v229_v16  ;;  %v234_v22 = vrot.slane %v225_v17, %v5795_v18  ;;  %v238_v28 = vrot.slane %v225_v17, %v5794_v20 }
 0x1ad   :  { %403 = vmatmul.mubr.bf16.vlgmr.msra.gmra.mrb[0].mxu0 %v191_v8  ;;  %4139 = vmatprep.mubr.bf16.mxu1 %v191_v8  ;;  %v190_v11 = vadd.f32 %v3822_v0, %v180_v9 }
 0x1ae   :  { %412 = vmatprep.mubr.bf16.mxu0 %v4914_v39 }
 0x1af   :  { %v192_v12 = vpack.c.bf16 %v190_v11, %v189_v10 }
 0x1b1   :  { %4140 = vmatmul.mubr.bf16.vlgmr.msra.gmra.mrb[0].mxu1 %v192_v12 }
 0x1b2   :  { %4145 = vmatprep.mubr.msk.bf16.mxu1 %vm4916_vm0, %v4915_v14 }
 0x1b5   :  { %413 = vmatmul.mubr.bf16.gmra.mrb[4].mxu0 %v192_v12 }
 0x1b6   :  { %4151 = vmatprep.mubr.msk.bf16.mxu0 %vm4916_vm0, %v4915_v14 }
 0x280   :  { %v404_v21 = vpop.f32.mrb[0].mxu0 }
 0x281   :  { %v406_v23 = vpop.f32.mrb[1].mxu0  ;;  %v405_v25 = vadd.f32 %v404_v21, %v230_v19 }
 0x282   :  { %v408_v24 = vpop.f32.mrb[2].mxu0  ;;  %v407_v29 = vadd.f32 %v406_v23, %v234_v22 }
 0x283   :  { %v409_v26 = vadd.f32 %v408_v24, %v230_v19  ;;  %v410_v27 = vpop.f32.mrb[3].mxu0 }
 0x284   :  { %v411_v30 = vadd.f32 %v410_v27, %v234_v22  ;;  %v4141_v31 = vpop.f32.mrb[0].mxu1 }
 0x285   :  { %v472_v32 = vpack.c.bf16 %v409_v26, %v405_v25  ;;  %v457_v33 = vpop.f32.mrb[1].mxu1  ;;  %v466_v36 = vadd.f32 %v4141_v31, %v238_v28 }
 0x286   :  { %v473_v34 = vpack.c.bf16 %v411_v30, %v407_v29  ;;  %v4142_v35 = vpop.f32.mrb[2].mxu1  ;;  %v458_v40 = vadd.f32 %v457_v33, %v238_v28 }
 0x287   :  { %v469_v37 = vadd.f32 %v4142_v35, %v238_v28  ;;  %v460_v38 = vpop.f32.mrb[3].mxu1 }
 0x288   :  { %v461_v41 = vadd.f32 %v460_v38, %v238_v28  ;;  %510 = vrot.lane.b32.xlu0 %v473_v34, %s4917_s4  ;;  %v414_v42 = vpop.f32.mrb[4].mxu0  ;;  %v587_v43 = vsel %vm582_vm1, %v473_v34, 0 }
 0x289   :  { %v5122_v44 = vpack.c.bf16 %v469_v37, %v466_v36  ;;  %v416_v45 = vpop.f32.mrb[5].mxu0  ;;  %4144 = vmatpush3.bf16.xpose.msra.mxu1 %v587_v43  ;;  %v415_v48 = vadd.f32 %v414_v42, %v230_v19 }
 0x28a   :  { %v5124_v46 = vpack.c.bf16 %v461_v41, %v458_v40  ;;  %v418_v47 = vpop.f32.mrb[6].mxu0  ;;  %4155 = vmatprep.subr.bf16.mxu1 %v4915_v14  ;;  %v417_v51 = vadd.f32 %v416_v45, %v234_v22 }
 0x28b   :  { %v419_v49 = vadd.f32 %v418_v47, %v230_v19  ;;  %v420_v50 = vpop.f32.mrb[7].mxu0 }
 0x28c   :  { %v421_v52 = vadd.f32 %v420_v50, %v234_v22  ;;  %514 = vrot.lane.b32.xlu0 %v473_v34, %s4918_s24 }
 0x28d   :  { %v475_v53 = vpack.c.bf16 %v419_v49, %v415_v48 }
 0x28e   :  { %v476_v54 = vpack.c.bf16 %v421_v52, %v417_v51 }
 0x290   :  { %484 = vrot.lane.b32.xlu0 %v472_v32, %s4918_s24  ;;  %4146 = vmatmul.mubr.msk.bf16.vlgmr.msra.gmra.mrb[4].mxu1 %vm582_vm1, %v472_v32  ;;  %v634_v55 = vsel %vm582_vm1, %v476_v54, 0 }
 0x291   :  { %512 = vrot.lane.b32.xlu1 %v476_v54, %s4917_s4  ;;  %4150 = vmatpush3.bf16.xpose.msra.mxu0 %v634_v55 }
 0x292   :  { %4161 = vmatprep.subr.bf16.mxu0 %v4915_v14  ;;  %4157 = vmatprep.mubr.msk.bf16.mxu1 %vm4916_vm0, %v4915_v14 }
 0x294   :  { %518 = vrot.lane.b32.xlu0 %v473_v34, %s4919_s25 }
 0x295   :  { %480 = vrot.lane.b32.xlu1 %v472_v32, %s4917_s4 }
 0x298   :  { %488 = vrot.lane.b32.xlu0 %v472_v32, %s4919_s25  ;;  %4152 = vmatmul.mubr.msk.bf16.vlgmr.msra.gmra.mrb[8].mxu0 %vm582_vm1, %v475_v53 }
 0x299   :  { %482 = vrot.lane.b32.xlu1 %v475_v53, %s4917_s4  ;;  %4163 = vmatprep.mubr.msk.bf16.mxu0 %vm4916_vm0, %v4915_v14 }
 0x29c   :  { %522 = vrot.lane.b32.xlu0 %v473_v34, %s4910_s0 }
 0x29d   :  { %516 = vrot.lane.b32.xlu1 %v476_v54, %s4918_s24 }
 0x2a0   :  { %492 = vrot.lane.b32.xlu0 %v472_v32, %s4910_s0 }
 0x2a1   :  { %486 = vrot.lane.b32.xlu1 %v475_v53, %s4918_s24 }
 0x2a4   :  { %526 = vrot.lane.b32.xlu0 %v473_v34, %s4920_s5 }
 0x2a5   :  { %520 = vrot.lane.b32.xlu1 %v476_v54, %s4919_s25 }
 0x2a8   :  { %496 = vrot.lane.b32.xlu0 %v472_v32, %s4920_s5 }
 0x2a9   :  { %490 = vrot.lane.b32.xlu1 %v475_v53, %s4919_s25 }
 0x2ac   :  { %530 = vrot.lane.b32.xlu0 %v473_v34, %s4921_s21 }
 0x2ad   :  { %524 = vrot.lane.b32.xlu1 %v476_v54, %s4910_s0 }
 0x2b0   :  { %500 = vrot.lane.b32.xlu0 %v472_v32, %s4921_s21 }
 0x2b1   :  { %494 = vrot.lane.b32.xlu1 %v475_v53, %s4910_s0 }
 0x2b4   :  { %534 = vrot.lane.b32.xlu0 %v473_v34, %s4905_s18 }
 0x2b5   :  { %528 = vrot.lane.b32.xlu1 %v476_v54, %s4920_s5 }
 0x2b8   :  { %504 = vrot.lane.b32.xlu0 %v472_v32, %s4905_s18 }
 0x2b9   :  { %498 = vrot.lane.b32.xlu1 %v475_v53, %s4920_s5 }
 0x2bc   :  { %540 = vrot.lane.b32.xlu0 %v5124_v46, %s4917_s4 }
 0x2bd   :  { %532 = vrot.lane.b32.xlu1 %v476_v54, %s4921_s21 }
 0x2c0   :  { %546 = vrot.lane.b32.xlu0 %v5124_v46, %s4918_s24 }
 0x2c1   :  { %502 = vrot.lane.b32.xlu1 %v475_v53, %s4921_s21 }
 0x2c4   :  { %552 = vrot.lane.b32.xlu0 %v5124_v46, %s4919_s25 }
 0x2c5   :  { %536 = vrot.lane.b32.xlu1 %v476_v54, %s4905_s18 }
 0x2c8   :  { %558 = vrot.lane.b32.xlu0 %v5124_v46, %s4910_s0 }
 0x2c9   :  { %506 = vrot.lane.b32.xlu1 %v475_v53, %s4905_s18 }
 0x2cd   :  { %542 = vrot.lane.b32.xlu1 %v5122_v44, %s4917_s4 }
 0x2d1   :  { %548 = vrot.lane.b32.xlu1 %v5122_v44, %s4918_s24 }
 0x2d5   :  { %554 = vrot.lane.b32.xlu1 %v5122_v44, %s4919_s25 }
 0x2d9   :  { %560 = vrot.lane.b32.xlu1 %v5122_v44, %s4910_s0 }
 0x2fa   :  { %v511_v56 = vpop.permute.xlu0 %510 }
 0x2fb   :  { %v681_v57 = vsel %vm582_vm1, %v511_v56, 0 }
 0x2fc   :  { %4156 = vmatpush3.bf16.xpose.msra.mxu1 %v681_v57 }
 0x2fd   :  { %4167 = vmatprep.subr.bf16.mxu1 %v4915_v14 }
 0x2fe   :  { %v515_v58 = vpop.permute.xlu0 %514 }
 0x2ff   :  { %v775_v0 = vsel %vm582_vm1, %v515_v58, 0 }
 0x302   :  { %v485_v59 = vpop.permute.xlu0 %484 }
 0x303   :  { %v513_v60 = vpop.permute.xlu1 %512 }
 0x304   :  { %v728_v61 = vsel %vm582_vm1, %v513_v60, 0 }
 0x305   :  { %4162 = vmatpush3.bf16.xpose.msra.mxu0 %v728_v61 }
 0x306   :  { %v519_v62 = vpop.permute.xlu0 %518  ;;  %4173 = vmatprep.subr.bf16.mxu0 %v4915_v14 }
 0x307   :  { %v481_v63 = vpop.permute.xlu1 %480  ;;  %v869_v5 = vsel %vm582_vm1, %v519_v62, 0 }
 0x308   :  { %4158 = vmatmul.mubr.msk.bf16.vlgmr.msra.gmra.mrb[8].mxu1 %vm582_vm1, %v481_v63 }
 0x309   :  { %4168 = vmatpush3.bf16.xpose.msra.mxu1 %v775_v0  ;;  %4169 = vmatprep.mubr.msk.bf16.mxu1 %vm4916_vm0, %v4915_v14 }
 0x30a   :  { %v489_v1 = vpop.permute.xlu0 %488  ;;  %4179 = vmatprep.subr.bf16.mxu1 %v4915_v14 }
 0x30b   :  { %v483_v2 = vpop.permute.xlu1 %482 }
 0x30c   :  { %4164 = vmatmul.mubr.msk.bf16.vlgmr.msra.gmra.mrb[12].mxu0 %vm582_vm1, %v483_v2 }
 0x30d   :  { %4175 = vmatprep.mubr.msk.bf16.mxu0 %vm4916_vm0, %v4915_v14 }
 0x30e   :  { %v523_v3 = vpop.permute.xlu0 %522 }
 0x30f   :  { %v517_v4 = vpop.permute.xlu1 %516  ;;  %v963_v11 = vsel %vm582_vm1, %v523_v3, 0 }
 0x310   :  { %v822_v6 = vsel %vm582_vm1, %v517_v4, 0  ;;  %4170 = vmatmul.mubr.msk.bf16.vlgmr.msra.gmra.mrb[12].mxu1 %vm582_vm1, %v485_v59 }
 0x311   :  { %4180 = vmatpush3.bf16.xpose.msra.mxu1 %v869_v5  ;;  %4174 = vmatpush3.bf16.xpose.msra.mxu0 %v822_v6 }
 0x312   :  { %v493_v7 = vpop.permute.xlu0 %492  ;;  %4181 = vmatprep.mubr.msk.bf16.mxu1 %vm4916_vm0, %v4915_v14  ;;  %4191 = vmatprep.subr.bf16.mxu1 %v4915_v14 }
 0x313   :  { %v487_v8 = vpop.permute.xlu1 %486  ;;  %4185 = vmatprep.subr.bf16.mxu0 %v4915_v14 }
 0x316   :  { %v527_v9 = vpop.permute.xlu0 %526 }
 0x317   :  { %v521_v10 = vpop.permute.xlu1 %520  ;;  %v1057_v21 = vsel %vm582_vm1, %v527_v9, 0 }
 0x318   :  { %v916_v12 = vsel %vm582_vm1, %v521_v10, 0  ;;  %4176 = vmatmul.mubr.msk.bf16.vlgmr.msra.gmra.mrb[16].mxu0 %vm582_vm1, %v487_v8  ;;  %4182 = vmatmul.mubr.msk.bf16.vlgmr.msra.gmra.mrb[16].mxu1 %vm582_vm1, %v489_v1 }
 0x319   :  { %4192 = vmatpush3.bf16.xpose.msra.mxu1 %v963_v11  ;;  %4186 = vmatpush3.bf16.xpose.msra.mxu0 %v916_v12 }
 0x31a   :  { %4187 = vmatprep.mubr.msk.bf16.mxu0 %vm4916_vm0, %v4915_v14  ;;  %4193 = vmatprep.mubr.msk.bf16.mxu1 %vm4916_vm0, %v4915_v14  ;;  %v497_v17 = vpop.permute.xlu0 %496 }
 0x31b   :  { %v491_v13 = vpop.permute.xlu1 %490  ;;  %4203 = vmatprep.subr.bf16.mxu1 %v4915_v14  ;;  %4197 = vmatprep.subr.bf16.mxu0 %v4915_v14 }
 0x31e   :  { %v531_v23 = vpop.permute.xlu0 %530 }
 0x31f   :  { %v525_v19 = vpop.permute.xlu1 %524  ;;  %v1151_v27 = vsel %vm582_vm1, %v531_v23, 0 }
 0x320   :  { %v1010_v22 = vsel %vm582_vm1, %v525_v19, 0  ;;  %4188 = vmatmul.mubr.msk.bf16.vlgmr.msra.gmra.mrb[20].mxu0 %vm582_vm1, %v491_v13  ;;  %4194 = vmatmul.mubr.msk.bf16.vlgmr.msra.gmra.mrb[20].mxu1 %vm582_vm1, %v493_v7 }
 0x321   :  { %4204 = vmatpush3.bf16.xpose.msra.mxu1 %v1057_v21  ;;  %4198 = vmatpush3.bf16.xpose.msra.mxu0 %v1010_v22 }
 0x322   :  { %4199 = vmatprep.mubr.msk.bf16.mxu0 %vm4916_vm0, %v4915_v14  ;;  %4205 = vmatprep.mubr.msk.bf16.mxu1 %vm4916_vm0, %v4915_v14  ;;  %v501_v25 = vpop.permute.xlu0 %500 }
 0x323   :  { %v495_v24 = vpop.permute.xlu1 %494  ;;  %4215 = vmatprep.subr.bf16.mxu1 %v4915_v14  ;;  %4209 = vmatprep.subr.bf16.mxu0 %v4915_v14 }
 0x326   :  { %v535_v30 = vpop.permute.xlu0 %534 }
 0x327   :  { %v529_v26 = vpop.permute.xlu1 %528  ;;  %v1245_v32 = vsel %vm582_vm1, %v535_v30, 0 }
 0x328   :  { %v1104_v28 = vsel %vm582_vm1, %v529_v26, 0  ;;  %4200 = vmatmul.mubr.msk.bf16.vlgmr.msra.gmra.mrb[24].mxu0 %vm582_vm1, %v495_v24  ;;  %4206 = vmatmul.mubr.msk.bf16.vlgmr.msra.gmra.mrb[24].mxu1 %vm582_vm1, %v497_v17 }
 0x329   :  { %4216 = vmatpush3.bf16.xpose.msra.mxu1 %v1151_v27  ;;  %4210 = vmatpush3.bf16.xpose.msra.mxu0 %v1104_v28 }
 0x32a   :  { %4211 = vmatprep.mubr.msk.bf16.mxu0 %vm4916_vm0, %v4915_v14  ;;  %4217 = vmatprep.mubr.msk.bf16.mxu1 %vm4916_vm0, %v4915_v14  ;;  %v505_v35 = vpop.permute.xlu0 %504 }
 0x32b   :  { %v499_v29 = vpop.permute.xlu1 %498  ;;  %4227 = vmatprep.subr.bf16.mxu1 %v4915_v14  ;;  %4221 = vmatprep.subr.bf16.mxu0 %v4915_v14 }
 0x32e   :  { %v5268_v54 = vpop.permute.xlu0 %540 }
 0x32f   :  { %v533_v31 = vpop.permute.xlu1 %532 }
 0x330   :  { %v1198_v33 = vsel %vm582_vm1, %v533_v31, 0  ;;  %4212 = vmatmul.mubr.msk.bf16.vlgmr.msra.gmra.mrb[28].mxu0 %vm582_vm1, %v499_v29  ;;  %4218 = vmatmul.mubr.msk.bf16.vlgmr.msra.gmra.mrb[28].mxu1 %vm582_vm1, %v501_v25 }
 0x331   :  { %4228 = vmatpush3.bf16.xpose.msra.mxu1 %v1245_v32  ;;  %4222 = vmatpush3.bf16.xpose.msra.mxu0 %v1198_v33 }
 0x332   :  { %4223 = vmatprep.mubr.msk.bf16.mxu0 %vm4916_vm0, %v4915_v14  ;;  %4229 = vmatprep.mubr.msk.bf16.mxu1 %vm4916_vm0, %v4915_v14  ;;  %v5274_v58 = vpop.permute.xlu0 %546 }
 0x333   :  { %v503_v34 = vpop.permute.xlu1 %502  ;;  %4239 = vmatprep.subr.bf16.mxu1 %v4915_v14  ;;  %4233 = vmatprep.subr.bf16.mxu0 %v4915_v14 }
 0x336   :  { %v5290_v5 = vpop.permute.xlu0 %552 }
 0x337   :  { %v537_v36 = vpop.permute.xlu1 %536 }
 0x338   :  { %v1292_v37 = vsel %vm582_vm1, %v537_v36, 0  ;;  %4224 = vmatmul.mubr.msk.bf16.vlgmr.msra.gmra.mrb[32].mxu0 %vm582_vm1, %v503_v34  ;;  %4230 = vmatmul.mubr.msk.bf16.vlgmr.msra.gmra.mrb[32].mxu1 %vm582_vm1, %v505_v35 }
 0x339   :  { %4240 = vmatpush3.bf16.msra.mxu1 %v5124_v46  ;;  %4234 = vmatpush3.bf16.xpose.msra.mxu0 %v1292_v37 }
 0x33a   :  { %4235 = vmatprep.mubr.msk.bf16.mxu0 %vm4916_vm0, %v4915_v14  ;;  %4245 = vmatprep.subr.bf16.mxu0 %v4915_v14  ;;  %v5302_v13 = vpop.permute.xlu0 %558 }
 0x33b   :  { %4241 = vmatprep.mubr.msk.bf16.mxu1 %vm4916_vm0, %v4915_v14  ;;  %4251 = vmatprep.subr.bf16.mxu1 %v4915_v14  ;;  %v507_v38 = vpop.permute.xlu1 %506 }
 0x33f   :  { %v5278_v60 = vpop.permute.xlu1 %542 }
 0x340   :  { %4236 = vmatmul.mubr.msk.bf16.vlgmr.msra.gmra.mrb[36].mxu0 %vm582_vm1, %v507_v38 }
 0x341   :  { %4246 = vmatpush3.bf16.msra.mxu0 %v5122_v44  ;;  %4247 = vmatprep.mubr.msk.bf16.mxu0 %vm4916_vm0, %v4915_v14 }
 0x342   :  { %4257 = vmatprep.subr.bf16.mxu0 %v4915_v14 }
 0x343   :  { %v5294_v7 = vpop.permute.xlu1 %548 }
 0x347   :  { %v5304_v17 = vpop.permute.xlu1 %554 }
 0x34b   :  { %v5320_v31 = vpop.permute.xlu1 %560 }
 0x363   :  { %v5252_v40 = vpop.f32.mrb[4].mxu1 }
 0x364   :  { %v4147_v41 = vpop.f32.mrb[5].mxu1  ;;  %v1335_v42 = vsel %vm582_vm1, %v5252_v40, -inf }
 0x365   :  { %v5256_v43 = vpop.f32.mrb[6].mxu1  ;;  %1336 = vmax.xlane.f32.xlu0 %v1335_v42 }
 0x366   :  { %v4148_v45 = vpop.f32.mrb[7].mxu1  ;;  %v1338_v47 = vsel %vm582_vm1, %v5256_v43, -inf }
 0x367   :  { %1339 = vmax.xlane.f32.xlu1 %v1338_v47 }
 0x36b   :  { %v5260_v48 = vpop.f32.mrb[8].mxu0 }
 0x36c   :  { %v4153_v49 = vpop.f32.mrb[9].mxu0  ;;  %v1341_v50 = vsel %vm582_vm1, %v5260_v48, -inf }
 0x36d   :  { %1342 = vmax.xlane.f32.xlu0 %v1341_v50  ;;  %v5264_v51 = vpop.f32.mrb[10].mxu0 }
 0x36e   :  { %v4154_v52 = vpop.f32.mrb[11].mxu0  ;;  %v1344_v53 = vsel %vm582_vm1, %v5264_v51, -inf }
 0x371   :  { %1345 = vmax.xlane.f32.xlu0 %v1344_v53 }
 0x3db   :  { %v5270_v55 = vpop.f32.mrb[8].mxu1 }
 0x3dc   :  { %v4159_v56 = vpop.f32.mrb[9].mxu1  ;;  %v1347_v57 = vsel %vm582_vm1, %v5270_v55, -inf }
 0x3dd   :  { %1348 = vmax.xlane.f32.xlu0 %v1347_v57  ;;  %v5276_v59 = vpop.f32.mrb[10].mxu1 }
 0x3de   :  { %v4160_v61 = vpop.f32.mrb[11].mxu1  ;;  %v1350_v62 = vsel %vm582_vm1, %v5276_v59, -inf }
 0x3df   :  { %v5282_v63 = vpop.f32.mrb[12].mxu0  ;;  %1351 = vmax.xlane.f32.xlu1 %v1350_v62 }
 0x3e0   :  { %v4165_v0 = vpop.f32.mrb[13].mxu0  ;;  %v1353_v1 = vsel %vm582_vm1, %v5282_v63, -inf }
 0x3e1   :  { %v5286_v2 = vpop.f32.mrb[14].mxu0  ;;  %1354 = vmax.xlane.f32.xlu0 %v1353_v1 }
 0x3e2   :  { %v4166_v3 = vpop.f32.mrb[15].mxu0  ;;  %v1356_v4 = vsel %vm582_vm1, %v5286_v2, -inf }
 0x3e3   :  { %1357 = vmax.xlane.f32.xlu1 %v1356_v4  ;;  %v5292_v6 = vpop.f32.mrb[12].mxu1 }
 0x3e4   :  { %v4171_v8 = vpop.f32.mrb[13].mxu1  ;;  %v1359_v9 = vsel %vm582_vm1, %v5292_v6, -inf }
 0x3e5   :  { %1360 = vmax.xlane.f32.xlu0 %v1359_v9  ;;  %v5298_v10 = vpop.f32.mrb[14].mxu1 }
 0x3e6   :  { %v4172_v11 = vpop.f32.mrb[15].mxu1  ;;  %v1362_v12 = vsel %vm582_vm1, %v5298_v10, -inf }
 0x3e7   :  { %1363 = vmax.xlane.f32.xlu1 %v1362_v12 }
 0x3eb   :  { %v5306_v19 = vpop.f32.mrb[16].mxu0  ;;  %v5308_v21 = vpop.f32.mrb[16].mxu1 }
 0x3ec   :  { %v4177_v22 = vpop.f32.mrb[17].mxu0  ;;  %v4183_v23 = vpop.f32.mrb[17].mxu1  ;;  %v1365_v24 = vsel %vm582_vm1, %v5306_v19, -inf  ;;  %v1371_v30 = vsel %vm582_vm1, %v5308_v21, -inf }
 0x3ed   :  { %v5312_v25 = vpop.f32.mrb[18].mxu0  ;;  %1366 = vmax.xlane.f32.xlu0 %v1365_v24  ;;  %v5314_v26 = vpop.f32.mrb[18].mxu1 }
 0x3ee   :  { %v4178_v27 = vpop.f32.mrb[19].mxu0  ;;  %v4184_v28 = vpop.f32.mrb[19].mxu1  ;;  %v1368_v29 = vsel %vm582_vm1, %v5312_v25, -inf  ;;  %v1374_v32 = vsel %vm582_vm1, %v5314_v26, -inf }
 0x3ef   :  { %1369 = vmax.xlane.f32.xlu1 %v1368_v29 }
 0x3f1   :  { %1372 = vmax.xlane.f32.xlu0 %v1371_v30 }
 0x3f2   :  { %v1337_v33 = vpop.xlane.xlu0 %1336 }
 0x3f3   :  { %v5324_v34 = vpop.f32.mrb[20].mxu0  ;;  %1375 = vmax.xlane.f32.xlu1 %v1374_v32  ;;  %v5326_v35 = vpop.f32.mrb[20].mxu1  ;;  %v1431_v50 = vsub.f32 %v5252_v40, %v1337_v33 }
 0x3f4   :  { %v4189_v36 = vpop.f32.mrb[21].mxu0  ;;  %v4195_v37 = vpop.f32.mrb[21].mxu1  ;;  %v1377_v38 = vsel %vm582_vm1, %v5324_v34, -inf  ;;  %v1383_v53 = vsel %vm582_vm1, %v5326_v35, -inf }
 0x3f5   :  { %v1340_v41 = vpop.xlane.xlu1 %1339  ;;  %v5330_v42 = vpop.f32.mrb[22].mxu0  ;;  %1378 = vmax.xlane.f32.xlu0 %v1377_v38  ;;  %v1463_v62 = vmul.f32 1.442695, %v1431_v50 }
 0x3f6   :  { %v5332_v45 = vpop.f32.mrb[22].mxu1  ;;  %v4190_v47 = vpop.f32.mrb[23].mxu0  ;;  %v1380_v49 = vsel %vm582_vm1, %v5330_v42, -inf  ;;  %v1432_v56 = vsub.f32 %v5256_v43, %v1340_v41 }
 0x3f7   :  { %v4196_v52 = vpop.f32.mrb[23].mxu1  ;;  %1381 = vmax.xlane.f32.xlu1 %v1380_v49  ;;  %v1386_v57 = vsel %vm582_vm1, %v5332_v45, -inf  ;;  %4562 = vpow2.f32 %v1463_v62 }
 0x3f8   :  { %v1465_v8 = vmul.f32 1.442695, %v1432_v56 }
 0x3f9   :  { %1384 = vmax.xlane.f32.xlu0 %v1383_v53 }
 0x3fa   :  { %v1343_v61 = vpop.xlane.xlu0 %1342  ;;  %4564 = vpow2.f32 %v1465_v8 }
 0x3fb   :  { %v5342_v0 = vpop.f32.mrb[24].mxu0  ;;  %1387 = vmax.xlane.f32.xlu1 %v1386_v57  ;;  %v5344_v1 = vpop.f32.mrb[24].mxu1  ;;  %v1433_v28 = vsub.f32 %v5260_v48, %v1343_v61 }
 0x3fc   :  { %v4201_v3 = vpop.f32.mrb[25].mxu0  ;;  %v4207_v40 = vpop.f32.mrb[25].mxu1  ;;  %v1389_v4 = vsel %vm582_vm1, %v5342_v0, -inf  ;;  %v1395_v23 = vsel %vm582_vm1, %v5344_v1, -inf }
 0x3fd   :  { %v5348_v9 = vpop.f32.mrb[26].mxu0  ;;  %1390 = vmax.xlane.f32.xlu0 %v1389_v4  ;;  %v5350_v43 = vpop.f32.mrb[26].mxu1  ;;  %v1467_v50 = vmul.f32 1.442695, %v1433_v28 }
 0x3fe   :  { %v4202_v11 = vpop.f32.mrb[27].mxu0  ;;  %v4208_v12 = vpop.f32.mrb[27].mxu1  ;;  %v1392_v22 = vsel %vm582_vm1, %v5348_v9, -inf  ;;  %v1398_v27 = vsel %vm582_vm1, %v5350_v43, -inf }
 0x3ff   :  { %1393 = vmax.xlane.f32.xlu1 %v1392_v22  ;;  %v1346_v24 = vpop.xlane.xlu0 %1345  ;;  %4566 = vpow2.f32 %v1467_v50 }
 0x400   :  { %v1434_v37 = vsub.f32 %v5264_v51, %v1346_v24 }
 0x401   :  { %1396 = vmax.xlane.f32.xlu0 %v1395_v23  ;;  %v5374_v53 = vpop.eup %4562 }
 0x402   :  { %v1469_v56 = vmul.f32 1.442695, %v1434_v37  ;;  %v1527_v4 = vsel %vm582_vm1, %v5374_v53, 0.0 }
 0x403   :  { %v5359_v29 = vpop.f32.mrb[28].mxu0  ;;  %1399 = vmax.xlane.f32.xlu1 %v1398_v27  ;;  %v5361_v30 = vpop.f32.mrb[28].mxu1 }
 0x404   :  { %v4213_v32 = vpop.f32.mrb[29].mxu0  ;;  %v4219_v33 = vpop.f32.mrb[29].mxu1  ;;  %v1401_v36 = vsel %vm582_vm1, %v5359_v29, -inf  ;;  %v1407_v52 = vsel %vm582_vm1, %v5361_v30, -inf  ;;  %4568 = vpow2.f32 %v1469_v56 }
 0x405   :  { %v5366_v38 = vpop.f32.mrb[30].mxu0  ;;  %1402 = vmax.xlane.f32.xlu0 %v1401_v36  ;;  %v5368_v41 = vpop.f32.mrb[30].mxu1 }
 0x406   :  { %v4214_v47 = vpop.f32.mrb[31].mxu0  ;;  %v4220_v49 = vpop.f32.mrb[31].mxu1  ;;  %v1404_v48 = vsel %vm582_vm1, %v5366_v38, -inf  ;;  %v1410_v51 = vsel %vm582_vm1, %v5368_v41, -inf }
 0x407   :  { %1405 = vmax.xlane.f32.xlu1 %v1404_v48  ;;  %v5378_v57 = vpop.eup %4564 }
 0x408   :  { %v1530_v23 = vsel %vm582_vm1, %v5378_v57, 0.0 }
 0x409   :  { %1408 = vmax.xlane.f32.xlu0 %v1407_v52  ;;  %v5400_v36 = vpop.eup %4566 }
 0x40a   :  { %v1533_v50 = vsel %vm582_vm1, %v5400_v36, 0.0 }
 0x40b   :  { %v5380_v61 = vpop.f32.mrb[32].mxu0  ;;  %1411 = vmax.xlane.f32.xlu1 %v1410_v51  ;;  %v5382_v62 = vpop.f32.mrb[32].mxu1 }
 0x40c   :  { %v4225_v3 = vpop.f32.mrb[33].mxu0  ;;  %v4231_v40 = vpop.f32.mrb[33].mxu1  ;;  %v1413_v24 = vsel %vm582_vm1, %v5380_v61, -inf  ;;  %v1419_v33 = vsel %vm582_vm1, %v5382_v62, -inf }
 0x40d   :  { %v5386_v8 = vpop.f32.mrb[34].mxu0  ;;  %v5388_v11 = vpop.f32.mrb[34].mxu1  ;;  %1528 = vadd.xlane.f32.xlu0 %v1527_v4 }
 0x40e   :  { %v4226_v12 = vpop.f32.mrb[35].mxu0  ;;  %v4232_v22 = vpop.f32.mrb[35].mxu1  ;;  %v1416_v27 = vsel %vm582_vm1, %v5386_v8, -inf  ;;  %v1422_v49 = vsel %vm582_vm1, %v5388_v11, -inf }
 0x40f   :  { %1531 = vadd.xlane.f32.xlu1 %v1530_v23  ;;  %v5406_v48 = vpop.eup %4568 }
 0x410   :  { %v1536_v52 = vsel %vm582_vm1, %v5406_v48, 0.0 }
 0x411   :  { %1414 = vmax.xlane.f32.xlu0 %v1413_v24 }
 0x413   :  { %v5396_v28 = vpop.f32.mrb[36].mxu0  ;;  %1417 = vmax.xlane.f32.xlu1 %v1416_v27 }
 0x414   :  { %v4237_v32 = vpop.f32.mrb[37].mxu0  ;;  %v1425_v56 = vsel %vm582_vm1, %v5396_v28, -inf }
 0x415   :  { %v5402_v37 = vpop.f32.mrb[38].mxu0  ;;  %1420 = vmax.xlane.f32.xlu0 %v1419_v33 }
 0x416   :  { %v4238_v47 = vpop.f32.mrb[39].mxu0  ;;  %v1428_v51 = vsel %vm582_vm1, %v5402_v37, -inf }
 0x417   :  { %1423 = vmax.xlane.f32.xlu1 %v1422_v49 }
 0x419   :  { %1534 = vadd.xlane.f32.xlu0 %v1533_v50 }
 0x41b   :  { %1537 = vadd.xlane.f32.xlu1 %v1536_v52 }
 0x41d   :  { %1426 = vmax.xlane.f32.xlu0 %v1425_v56 }
 0x41f   :  { %1429 = vmax.xlane.f32.xlu1 %v1428_v51 }
 0x46a   :  { %v1349_v3 = vpop.xlane.xlu0 %1348 }
 0x46b   :  { %v1435_v40 = vsub.f32 %v5270_v55, %v1349_v3 }
 0x46c   :  { %v1352_v4 = vpop.xlane.xlu1 %1351 }
 0x46d   :  { %v1471_v12 = vmul.f32 1.442695, %v1435_v40  ;;  %v1436_v22 = vsub.f32 %v5276_v59, %v1352_v4 }
 0x46e   :  { %v1355_v23 = vpop.xlane.xlu0 %1354 }
 0x46f   :  { %4570 = vpow2.f32 %v1471_v12  ;;  %v1473_v24 = vmul.f32 1.442695, %v1436_v22  ;;  %v1437_v27 = vsub.f32 %v5282_v63, %v1355_v23 }
 0x470   :  { %v1358_v32 = vpop.xlane.xlu1 %1357 }
 0x471   :  { %4572 = vpow2.f32 %v1473_v24  ;;  %v1475_v33 = vmul.f32 1.442695, %v1437_v27  ;;  %v1438_v47 = vsub.f32 %v5286_v2, %v1358_v32 }
 0x472   :  { %v1361_v49 = vpop.xlane.xlu0 %1360 }
 0x473   :  { %4574 = vpow2.f32 %v1475_v33  ;;  %v1477_v50 = vmul.f32 1.442695, %v1438_v47  ;;  %v1439_v52 = vsub.f32 %v5292_v6, %v1361_v49 }
 0x474   :  { %v1364_v55 = vpop.xlane.xlu1 %1363 }
 0x475   :  { %4576 = vpow2.f32 %v1477_v50  ;;  %v1479_v56 = vmul.f32 1.442695, %v1439_v52  ;;  %v1440_v59 = vsub.f32 %v5298_v10, %v1364_v55 }
 0x477   :  { %4578 = vpow2.f32 %v1479_v56  ;;  %v1481_v51 = vmul.f32 1.442695, %v1440_v59 }
 0x479   :  { %v5422_v3 = vpop.eup %4570  ;;  %4580 = vpow2.f32 %v1481_v51 }
 0x47a   :  { %v1367_v63 = vpop.xlane.xlu0 %1366  ;;  %v1539_v40 = vsel %vm582_vm1, %v5422_v3, 0.0 }
 0x47b   :  { %v5426_v2 = vpop.eup %4572  ;;  %v1441_v4 = vsub.f32 %v5306_v19, %v1367_v63  ;;  %1540 = vadd.xlane.f32.xlu0 %v1539_v40 }
 0x47c   :  { %v1370_v6 = vpop.xlane.xlu1 %1369  ;;  %v1542_v12 = vsel %vm582_vm1, %v5426_v2, 0.0 }
 0x47d   :  { %v5431_v22 = vpop.eup %4574  ;;  %v1483_v10 = vmul.f32 1.442695, %v1441_v4  ;;  %v1442_v23 = vsub.f32 %v5312_v25, %v1370_v6  ;;  %1543 = vadd.xlane.f32.xlu1 %v1542_v12 }
 0x47e   :  { %v1373_v24 = vpop.xlane.xlu0 %1372  ;;  %v1545_v27 = vsel %vm582_vm1, %v5431_v22, 0.0 }
 0x47f   :  { %v5436_v32 = vpop.eup %4576  ;;  %4582 = vpow2.f32 %v1483_v10  ;;  %v1485_v33 = vmul.f32 1.442695, %v1442_v23  ;;  %v1443_v19 = vsub.f32 %v5308_v21, %v1373_v24  ;;  %1546 = vadd.xlane.f32.xlu0 %v1545_v27 }
 0x480   :  { %v1376_v47 = vpop.xlane.xlu1 %1375  ;;  %v1548_v49 = vsel %vm582_vm1, %v5436_v32, 0.0 }
 0x481   :  { %v5441_v50 = vpop.eup %4578  ;;  %4584 = vpow2.f32 %v1485_v33  ;;  %v1487_v25 = vmul.f32 1.442695, %v1443_v19  ;;  %v1444_v52 = vsub.f32 %v5314_v26, %v1376_v47  ;;  %1549 = vadd.xlane.f32.xlu1 %v1548_v49 }
 0x482   :  { %v1379_v55 = vpop.xlane.xlu0 %1378  ;;  %v1551_v56 = vsel %vm582_vm1, %v5441_v50, 0.0 }
 0x483   :  { %v5446_v59 = vpop.eup %4580  ;;  %4586 = vpow2.f32 %v1487_v25  ;;  %v1489_v21 = vmul.f32 1.442695, %v1444_v52  ;;  %v1445_v51 = vsub.f32 %v5324_v34, %v1379_v55  ;;  %1552 = vadd.xlane.f32.xlu0 %v1551_v56 }
 0x484   :  { %v1382_v63 = vpop.xlane.xlu1 %1381  ;;  %v1554_v40 = vsel %vm582_vm1, %v5446_v59, 0.0 }
 0x485   :  { %4588 = vpow2.f32 %v1489_v21  ;;  %v1491_v4 = vmul.f32 1.442695, %v1445_v51  ;;  %v1446_v26 = vsub.f32 %v5330_v42, %v1382_v63  ;;  %1555 = vadd.xlane.f32.xlu1 %v1554_v40 }
 0x486   :  { %v1385_v6 = vpop.xlane.xlu0 %1384 }
 0x487   :  { %4590 = vpow2.f32 %v1491_v4  ;;  %v1447_v12 = vsub.f32 %v5326_v35, %v1385_v6  ;;  %v1493_v10 = vmul.f32 1.442695, %v1446_v26 }
 0x488   :  { %v1388_v23 = vpop.xlane.xlu1 %1387 }
 0x489   :  { %v5453_v24 = vpop.eup %4582  ;;  %v1495_v27 = vmul.f32 1.442695, %v1447_v12  ;;  %v1448_v34 = vsub.f32 %v5332_v45, %v1388_v23 }
 0x48a   :  { %v1391_v33 = vpop.xlane.xlu0 %1390  ;;  %v1557_v19 = vsel %vm582_vm1, %v5453_v24, 0.0 }
 0x48b   :  { %v5458_v47 = vpop.eup %4584  ;;  %4592 = vpow2.f32 %v1495_v27  ;;  %v1497_v42 = vmul.f32 1.442695, %v1448_v34  ;;  %v1449_v49 = vsub.f32 %v5342_v0, %v1391_v33  ;;  %1558 = vadd.xlane.f32.xlu0 %v1557_v19 }
 0x48c   :  { %4594 = vpow2.f32 %v1493_v10  ;;  %v1394_v35 = vpop.xlane.xlu1 %1393  ;;  %v1560_v25 = vsel %vm582_vm1, %v5458_v47, 0.0 }
 0x48d   :  { %v5463_v52 = vpop.eup %4586  ;;  %4596 = vpow2.f32 %v1497_v42  ;;  %v1499_v45 = vmul.f32 1.442695, %v1449_v49  ;;  %v1450_v55 = vsub.f32 %v5348_v9, %v1394_v35  ;;  %1561 = vadd.xlane.f32.xlu1 %v1560_v25 }
 0x48e   :  { %v1397_v56 = vpop.xlane.xlu0 %1396  ;;  %v1563_v21 = vsel %vm582_vm1, %v5463_v52, 0.0 }
 0x48f   :  { %v5468_v51 = vpop.eup %4588  ;;  %4598 = vpow2.f32 %v1499_v45  ;;  %v1451_v0 = vsub.f32 %v5344_v1, %v1397_v56  ;;  %1564 = vadd.xlane.f32.xlu0 %v1563_v21  ;;  %v1501_v63 = vmul.f32 1.442695, %v1450_v55 }
 0x490   :  { %v1400_v40 = vpop.xlane.xlu1 %1399  ;;  %v1566_v4 = vsel %vm582_vm1, %v5468_v51, 0.0 }
 0x491   :  { %v5473_v26 = vpop.eup %4590  ;;  %v1503_v6 = vmul.f32 1.442695, %v1451_v0  ;;  %v1452_v9 = vsub.f32 %v5350_v43, %v1400_v40  ;;  %1567 = vadd.xlane.f32.xlu1 %v1566_v4 }
 0x492   :  { %v1403_v12 = vpop.xlane.xlu0 %1402  ;;  %v1569_v10 = vsel %vm582_vm1, %v5473_v26, 0.0 }
 0x493   :  { %4600 = vpow2.f32 %v1503_v6  ;;  %v1505_v23 = vmul.f32 1.442695, %v1452_v9  ;;  %v1453_v1 = vsub.f32 %v5359_v29, %v1403_v12  ;;  %1570 = vadd.xlane.f32.xlu0 %v1569_v10 }
 0x494   :  { %4602 = vpow2.f32 %v1501_v63  ;;  %v5479_v27 = vpop.xlane.xlu1 %1405 }
 0x495   :  { %v5481_v34 = vpop.eup %4592  ;;  %4604 = vpow2.f32 %v1505_v23  ;;  %v1507_v33 = vmul.f32 1.442695, %v1453_v1 }
 0x496   :  { %v5483_v19 = vpop.eup %4594  ;;  %v5485_v43 = vpop.xlane.xlu0 %1408  ;;  %v1575_v42 = vsel %vm582_vm1, %v5481_v34, 0.0 }
 0x497   :  { %v5489_v49 = vpop.eup %4596  ;;  %4606 = vpow2.f32 %v1507_v33  ;;  %1576 = vadd.xlane.f32.xlu1 %v1575_v42  ;;  %v1572_v55 = vsel %vm582_vm1, %v5483_v19, 0.0 }
 0x498   :  { %v1412_v29 = vpop.xlane.xlu1 %1411  ;;  %v1578_v35 = vsel %vm582_vm1, %v5489_v49, 0.0 }
 0x499   :  { %v5493_v25 = vpop.eup %4598  ;;  %1579 = vadd.xlane.f32.xlu0 %v1578_v35 }
 0x49a   :  { %v1529_v45 = vpop.xlane.xlu0 %1528  ;;  %v1581_v21 = vsel %vm582_vm1, %v5493_v25, 0.0 }
 0x49b   :  { %1573 = vadd.xlane.f32.xlu1 %v1572_v55  ;;  %4608 = vrcp.f32 %v1529_v45 }
 0x49c   :  { %v1532_v56 = vpop.xlane.xlu1 %1531 }
 0x49d   :  { %v5499_v0 = vpop.eup %4600  ;;  %1582 = vadd.xlane.f32.xlu0 %v1581_v21  ;;  %4610 = vrcp.f32 %v1532_v56 }
 0x49e   :  { %v5501_v63 = vpop.eup %4602  ;;  %v1415_v40 = vpop.xlane.xlu0 %1414  ;;  %v1587_v4 = vsel %vm582_vm1, %v5499_v0, 0.0 }
 0x49f   :  { %v5505_v6 = vpop.eup %4604  ;;  %1588 = vadd.xlane.f32.xlu1 %v1587_v4  ;;  %v1584_v33 = vsel %vm582_vm1, %v5501_v63, 0.0 }
 0x4a0   :  { %v5507_v9 = vpop.xlane.xlu1 %1417  ;;  %v1590_v12 = vsel %vm582_vm1, %v5505_v6, 0.0 }
 0x4a1   :  { %v5511_v10 = vpop.eup %4606  ;;  %v1458_v23 = vsub.f32 %v5386_v8, %v5507_v9  ;;  %1591 = vadd.xlane.f32.xlu0 %v1590_v12 }
 0x4a2   :  { %v5515_v1 = vpop.xlane.xlu0 %1420  ;;  %v1593_v45 = vsel %vm582_vm1, %v5511_v10, 0.0 }
 0x4a3   :  { %v1459_v42 = vsub.f32 %v5382_v62, %v5515_v1  ;;  %1585 = vadd.xlane.f32.xlu1 %v1584_v33 }
 0x4a4   :  { %v1424_v35 = vpop.xlane.xlu1 %1423 }
 0x4a5   :  { %1594 = vadd.xlane.f32.xlu0 %v1593_v45  ;;  %v4609_v55 = vpop.eup %4608 }
 0x4a6   :  { %v1535_v56 = vpop.xlane.xlu0 %1534  ;;  %v1624_v12 = vmul.f32 %v4609_v55, %v5374_v53 }
 0x4a7   :  { %v4611_v21 = vpop.eup %4610  ;;  %4612 = vrcp.f32 %v1535_v56 }
 0x4a8   :  { %v1538_v4 = vpop.xlane.xlu1 %1537  ;;  %v1626_v20 = vmul.f32 %v4611_v21, %v5378_v57  ;;  %v1460_v21 = vsub.f32 %v5388_v11, %v1424_v35 }
 0x4a9   :  { %4614 = vrcp.f32 %v1538_v4 }
 0x4aa   :  { %v1687_v18 = vpack.c.bf16 %v1626_v20, %v1624_v12  ;;  %v1455_v20 = vsub.f32 %v5361_v30, %v5485_v43  ;;  %v1427_v4 = vpop.xlane.xlu0 %1426 }
 0x4ac   :  { %4242 = vmatmul.mubr.msk.bf16.vlgmr.msra.gmra.mrb[36].mxu1 %vm582_vm1, %v1687_v18  ;;  %v1456_v18 = vsub.f32 %v5368_v41, %v1412_v29  ;;  %v1461_v41 = vsub.f32 %v5396_v28, %v1427_v4 }
 0x4ad   :  { %4252 = vmatpush3.bf16.msra.mxu1 %v5268_v54  ;;  %4253 = vmatprep.mubr.msk.bf16.mxu1 %vm4916_vm0, %v4915_v14 }
 0x4ae   :  { %4263 = vmatprep.subr.bf16.mxu1 %v4915_v14  ;;  %v1513_v54 = vmul.f32 1.442695, %v1456_v18  ;;  %v1523_v30 = vmul.f32 1.442695, %v1461_v41  ;;  %v1430_v18 = vpop.xlane.xlu1 %1429 }
 0x4b0   :  { %4616 = vpow2.f32 %v1513_v54  ;;  %v1462_v54 = vsub.f32 %v5402_v37, %v1430_v18 }
 0x4b1   :  { %v4613_v33 = vpop.eup %4612 }
 0x4b2   :  { %v1628_v53 = vmul.f32 %v4613_v33, %v5400_v36  ;;  %v1457_v36 = vsub.f32 %v5380_v61, %v1415_v40  ;;  %v1521_v33 = vmul.f32 1.442695, %v1460_v21 }
 0x4b3   :  { %v4615_v45 = vpop.eup %4614 }
 0x4b4   :  { %566 = vrot.lane.b32.xlu1 %v5122_v44, %s4920_s5  ;;  %v1630_v57 = vmul.f32 %v4615_v45, %v5406_v48  ;;  %v1454_v48 = vsub.f32 %v5366_v38, %v5479_v27  ;;  %v1515_v56 = vmul.f32 1.442695, %v1457_v36 }
 0x4b6   :  { %v1688_v55 = vpack.c.bf16 %v1630_v57, %v1628_v53  ;;  %v1509_v12 = vmul.f32 1.442695, %v1454_v48  ;;  %v1525_v48 = vmul.f32 1.442695, %v1462_v54 }
 0x4b8   :  { %570 = vrot.lane.b32.xlu1 %v5124_v46, %s4921_s21  ;;  %4248 = vmatmul.mubr.msk.bf16.vlgmr.msra.gmra.mrb[40].mxu0 %vm582_vm1, %v1688_v55  ;;  %v1519_v55 = vmul.f32 1.442695, %v1459_v42 }
 0x4b9   :  { %4258 = vmatpush3.bf16.msra.mxu0 %v5278_v60  ;;  %4259 = vmatprep.mubr.msk.bf16.mxu0 %vm4916_vm0, %v4915_v14  ;;  %v1511_v60 = vmul.f32 1.442695, %v1455_v20  ;;  %v1517_v20 = vmul.f32 1.442695, %v1458_v23 }
 0x4ba   :  { %4269 = vmatprep.subr.bf16.mxu0 %v4915_v14  ;;  %v5551_v43 = vpop.eup %4616 }
 0x4bb   :  { %564 = vrot.lane.b32.xlu0 %v5124_v46, %s4920_s5  ;;  %4618 = vpow2.f32 %v1511_v60  ;;  %v1602_v38 = vsel %vm582_vm1, %v5551_v43, 0.0 }
 0x4bc   :  { %4620 = vpow2.f32 %v1515_v56 }
 0x4bd   :  { %4622 = vpow2.f32 %v1509_v12 }
 0x4be   :  { %4624 = vpow2.f32 %v1521_v33 }
 0x4bf   :  { %4626 = vpow2.f32 %v1523_v30 }
 0x4c0   :  { %4628 = vpow2.f32 %v1519_v55 }
 0x4c5   :  { %v5553_v61 = vpop.eup %4618 }
 0x4c6   :  { %v5557_v27 = vpop.eup %4620  ;;  %v1599_v11 = vsel %vm582_vm1, %v5553_v61, 0.0 }
 0x4c7   :  { %v5561_v29 = vpop.eup %4622  ;;  %v1605_v28 = vsel %vm582_vm1, %v5557_v27, 0.0 }
 0x4c8   :  { %v5565_v40 = vpop.eup %4624  ;;  %v1596_v35 = vsel %vm582_vm1, %v5561_v29, 0.0 }
 0x4c9   :  { %v1614_v45 = vsel %vm582_vm1, %v5565_v40, 0.0  ;;  %v5571_v53 = vpop.eup %4626 }
 0x4ca   :  { %v1617_v57 = vsel %vm582_vm1, %v5571_v53, 0.0  ;;  %v5586_v1 = vpop.eup %4628 }
 0x4cb   :  { %v1611_v23 = vsel %vm582_vm1, %v5586_v1, 0.0 }
 0x4da   :  { %1603 = vadd.xlane.f32.xlu0 %v1602_v38 }
 0x4dc   :  { %1600 = vadd.xlane.f32.xlu1 %v1599_v11 }
 0x4de   :  { %1606 = vadd.xlane.f32.xlu0 %v1605_v28 }
 0x4e0   :  { %1597 = vadd.xlane.f32.xlu1 %v1596_v35 }
 0x4e2   :  { %1615 = vadd.xlane.f32.xlu0 %v1614_v45 }
 0x4e6   :  { %1618 = vadd.xlane.f32.xlu0 %v1617_v57 }
 0x4f1   :  { %572 = vrot.lane.b32.xlu1 %v5122_v44, %s4921_s21 }
 0x4fc   :  { %576 = vrot.lane.b32.xlu0 %v5124_v46, %s4905_s18 }
 0x508   :  { %v1541_v36 = vpop.xlane.xlu0 %1540 }
 0x509   :  { %4630 = vrcp.f32 %v1541_v36 }
 0x50a   :  { %4632 = vpow2.f32 %v1517_v20  ;;  %v1544_v60 = vpop.xlane.xlu1 %1543 }
 0x50b   :  { %4634 = vrcp.f32 %v1544_v60 }
 0x50c   :  { %v1547_v56 = vpop.xlane.xlu0 %1546 }
 0x50d   :  { %4636 = vrcp.f32 %v1547_v56 }
 0x50e   :  { %4638 = vpow2.f32 %v1525_v48  ;;  %v1550_v46 = vpop.xlane.xlu1 %1549 }
 0x50f   :  { %4640 = vrcp.f32 %v1550_v46 }
 0x510   :  { %v1553_v62 = vpop.xlane.xlu0 %1552 }
 0x511   :  { %4642 = vrcp.f32 %v1553_v62 }
 0x512   :  { %v1556_v8 = vpop.xlane.xlu1 %1555 }
 0x513   :  { %v4631_v9 = vpop.eup %4630  ;;  %4644 = vrcp.f32 %v1556_v8 }
 0x514   :  { %v5588_v37 = vpop.eup %4632  ;;  %v1632_v21 = vmul.f32 %v4631_v9, %v5422_v3 }
 0x515   :  { %v4635_v42 = vpop.eup %4634  ;;  %1612 = vadd.xlane.f32.xlu1 %v1611_v23  ;;  %v1608_v30 = vsel %vm582_vm1, %v5588_v37, 0.0 }
 0x516   :  { %v1634_v4 = vmul.f32 %v4635_v42, %v5426_v2 }
 0x517   :  { %v4637_v12 = vpop.eup %4636 }
 0x518   :  { %v5594_v33 = vpop.eup %4638  ;;  %v1559_v41 = vpop.xlane.xlu0 %1558  ;;  %v1689_v38 = vpack.c.bf16 %v1634_v4, %v1632_v21  ;;  %v1636_v28 = vmul.f32 %v4637_v12, %v5431_v22 }
 0x519   :  { %v4641_v11 = vpop.eup %4640  ;;  %4646 = vrcp.f32 %v1559_v41  ;;  %1609 = vadd.xlane.f32.xlu1 %v1608_v30  ;;  %v1620_v57 = vsel %vm582_vm1, %v5594_v33, 0.0 }
 0x51a   :  { %v1638_v35 = vmul.f32 %v4641_v11, %v5436_v32  ;;  %v1562_v45 = vpop.xlane.xlu1 %1561  ;;  %4254 = vmatmul.mubr.msk.bf16.vlgmr.msra.gmra.mrb[40].mxu1 %vm582_vm1, %v1689_v38 }
 0x51b   :  { %v4643_v3 = vpop.eup %4642  ;;  %4648 = vrcp.f32 %v1562_v45  ;;  %4264 = vmatpush3.bf16.msra.mxu1 %v5274_v58  ;;  %4265 = vmatprep.mubr.msk.bf16.mxu1 %vm4916_vm0, %v4915_v14 }
 0x51c   :  { %v1565_v2 = vpop.xlane.xlu0 %1564  ;;  %v1690_v55 = vpack.c.bf16 %v1638_v35, %v1636_v28  ;;  %4275 = vmatprep.subr.bf16.mxu1 %v4915_v14  ;;  %v1640_v32 = vmul.f32 %v4643_v3, %v5441_v50 }
 0x51d   :  { %v4645_v22 = vpop.eup %4644  ;;  %4650 = vrcp.f32 %v1565_v2  ;;  %1621 = vadd.xlane.f32.xlu1 %v1620_v57 }
 0x51e   :  { %v1642_v18 = vmul.f32 %v4645_v22, %v5446_v59  ;;  %v1568_v20 = vpop.xlane.xlu1 %1567  ;;  %4260 = vmatmul.mubr.msk.bf16.vlgmr.msra.gmra.mrb[44].mxu0 %vm582_vm1, %v1690_v55 }
 0x51f   :  { %4652 = vrcp.f32 %v1568_v20  ;;  %4270 = vmatpush3.bf16.msra.mxu0 %v5294_v7  ;;  %4271 = vmatprep.mubr.msk.bf16.mxu0 %vm4916_vm0, %v4915_v14 }
 0x520   :  { %v1691_v58 = vpack.c.bf16 %v1642_v18, %v1640_v32  ;;  %4281 = vmatprep.subr.bf16.mxu0 %v4915_v14  ;;  %v1571_v54 = vpop.xlane.xlu0 %1570 }
 0x522   :  { %4266 = vmatmul.mubr.msk.bf16.vlgmr.msra.gmra.mrb[44].mxu1 %vm582_vm1, %v1691_v58 }
 0x523   :  { %v4647_v36 = vpop.eup %4646  ;;  %4276 = vmatpush3.bf16.msra.mxu1 %v5290_v5  ;;  %4277 = vmatprep.mubr.msk.bf16.mxu1 %vm4916_vm0, %v4915_v14 }
 0x524   :  { %v1577_v50 = vpop.xlane.xlu1 %1576  ;;  %4287 = vmatprep.subr.bf16.mxu1 %v4915_v14  ;;  %v1644_v7 = vmul.f32 %v4647_v36, %v5453_v24 }
 0x525   :  { %v4649_v59 = vpop.eup %4648  ;;  %4654 = vrcp.f32 %v1577_v50 }
 0x526   :  { %v1646_v48 = vmul.f32 %v4649_v59, %v5458_v47  ;;  %4656 = vrcp.f32 %v1571_v54  ;;  %v1580_v60 = vpop.xlane.xlu0 %1579 }
 0x527   :  { %v4651_v56 = vpop.eup %4650  ;;  %4658 = vrcp.f32 %v1580_v60 }
 0x528   :  { %v1574_v46 = vpop.xlane.xlu1 %1573  ;;  %v1692_v62 = vpack.c.bf16 %v1646_v48, %v1644_v7  ;;  %v1648_v5 = vmul.f32 %v4651_v56, %v5463_v52  ;;  %v4466_v48 = vld [vmem:[#allocation7] sm:$0xff]  }
 0x529   :  { %v4653_v8 = vpop.eup %4652  ;;  %4660 = vrcp.f32 %v1574_v46 }
 0x52a   :  { %v1650_v9 = vmul.f32 %v4653_v8, %v5468_v51  ;;  %4272 = vmatmul.mubr.msk.bf16.vlgmr.msra.gmra.mrb[48].mxu0 %vm582_vm1, %v1692_v62  ;;  %v1583_v23 = vpop.xlane.xlu0 %1582 }
 0x52b   :  { %4282 = vmatpush3.bf16.msra.mxu0 %v5304_v17  ;;  %4283 = vmatprep.mubr.msk.bf16.mxu0 %vm4916_vm0, %v4915_v14 }
 0x52c   :  { %v1589_v24 = vpop.xlane.xlu1 %1588  ;;  %v1693_v47 = vpack.c.bf16 %v1650_v9, %v1648_v5  ;;  %4293 = vmatprep.subr.bf16.mxu0 %v4915_v14 }
 0x52d   :  { %4662 = vrcp.f32 %v1589_v24 }
 0x52e   :  { %4664 = vrcp.f32 %v1583_v23  ;;  %578 = vrot.lane.b32.xlu1 %v5122_v44, %s4905_s18  ;;  %4278 = vmatmul.mubr.msk.bf16.vlgmr.msra.gmra.mrb[48].mxu1 %vm582_vm1, %v1693_v47  ;;  %v1592_v52 = vpop.xlane.xlu0 %1591 }
 0x52f   :  { %v4655_v51 = vpop.eup %4654  ;;  %4288 = vmatpush3.bf16.msra.mxu1 %v5302_v13  ;;  %4666 = vrcp.f32 %v1592_v52  ;;  %4289 = vmatprep.mubr.msk.bf16.mxu1 %vm4916_vm0, %v4915_v14 }
 0x530   :  { %v4657_v17 = vpop.eup %4656  ;;  %v1586_v42 = vpop.xlane.xlu1 %1585  ;;  %4299 = vmatprep.subr.bf16.mxu1 %v4915_v14  ;;  %v1656_v4 = vmul.f32 %v4655_v51, %v5481_v34 }
 0x531   :  { %v4659_v21 = vpop.eup %4658  ;;  %4668 = vrcp.f32 %v1586_v42  ;;  %v1652_v30 = vmul.f32 %v4657_v17, %v5473_v26 }
 0x532   :  { %v1658_v44 = vmul.f32 %v4659_v21, %v5489_v49  ;;  %v1595_v12 = vpop.xlane.xlu0 %1594 }
 0x533   :  { %v4661_v41 = vpop.eup %4660 }
 0x534   :  { %v1654_v13 = vmul.f32 %v4661_v41, %v5483_v19  ;;  %v1695_v38 = vpack.c.bf16 %v1658_v44, %v1656_v4  ;;  %v567_v34 = vpop.permute.xlu1 %566 }
 0x536   :  { %4290 = vmatmul.mubr.msk.bf16.vlgmr.msra.gmra.mrb[52].mxu1 %vm582_vm1, %v1695_v38  ;;  %v565_v11 = vpop.permute.xlu0 %564  ;;  %v1694_v28 = vpack.c.bf16 %v1654_v13, %v1652_v30  ;;  %v4467_v13 = vld [vmem:[#allocation7 + $0x8] sm:$0xff]  }
 0x537   :  { %v4663_v35 = vpop.eup %4662  ;;  %4300 = vmatpush3.bf16.msra.mxu1 %v565_v11  ;;  %4301 = vmatprep.mubr.msk.bf16.mxu1 %vm4916_vm0, %v4915_v14 }
 0x538   :  { %v4665_v45 = vpop.eup %4664  ;;  %4284 = vmatmul.mubr.msk.bf16.vlgmr.msra.gmra.mrb[52].mxu0 %vm582_vm1, %v1694_v28  ;;  %4311 = vmatprep.subr.bf16.mxu1 %v4915_v14  ;;  %v1664_v26 = vmul.f32 %v4663_v35, %v5499_v0  ;;  %v571_v22 = vpop.permute.xlu1 %570 }
 0x539   :  { %v4667_v49 = vpop.eup %4666  ;;  %4294 = vmatpush3.bf16.msra.mxu0 %v5320_v31  ;;  %4295 = vmatprep.mubr.msk.bf16.mxu0 %vm4916_vm0, %v4915_v14  ;;  %v1660_v2 = vmul.f32 %v4665_v45, %v5493_v25 }
 0x53a   :  { %v1666_v19 = vmul.f32 %v4667_v49, %v5505_v6  ;;  %4305 = vmatprep.subr.bf16.mxu0 %v4915_v14 }
 0x53b   :  { %v4669_v3 = vpop.eup %4668 }
 0x53c   :  { %v1662_v57 = vmul.f32 %v4669_v3, %v5501_v63  ;;  %v1697_v55 = vpack.c.bf16 %v1666_v19, %v1664_v26 }
 0x53e   :  { %4302 = vmatmul.mubr.msk.bf16.vlgmr.msra.gmra.mrb[56].mxu1 %vm582_vm1, %v1697_v55  ;;  %v1696_v32 = vpack.c.bf16 %v1662_v57, %v1660_v2 }
 0x53f   :  { %4312 = vmatpush3.bf16.msra.mxu1 %v571_v22  ;;  %4313 = vmatprep.mubr.msk.bf16.mxu1 %vm4916_vm0, %v4915_v14 }
 0x540   :  { %4296 = vmatmul.mubr.msk.bf16.vlgmr.msra.gmra.mrb[56].mxu0 %vm582_vm1, %v1696_v32  ;;  %4323 = vmatprep.subr.bf16.mxu1 %v4915_v14  ;;  %v4469_v32 = vld [vmem:[#allocation7 + $0x18] sm:$0xff]  }
 0x541   :  { %4306 = vmatpush3.bf16.msra.mxu0 %v567_v34  ;;  %4307 = vmatprep.mubr.msk.bf16.mxu0 %vm4916_vm0, %v4915_v14 }
 0x542   :  { %4317 = vmatprep.subr.bf16.mxu0 %v4915_v14 }
 0x567   :  { %v1604_v31 = vpop.xlane.xlu0 %1603 }
 0x568   :  { %4670 = vrcp.f32 %v1604_v31 }
 0x569   :  { %v1601_v25 = vpop.xlane.xlu1 %1600 }
 0x56a   :  { %4672 = vrcp.f32 %v1601_v25 }
 0x56b   :  { %v1607_v0 = vpop.xlane.xlu0 %1606  ;;  %4674 = vrcp.f32 %v1595_v12 }
 0x56d   :  { %v1598_v63 = vpop.xlane.xlu1 %1597 }
 0x56e   :  { %4676 = vrcp.f32 %v1598_v63 }
 0x56f   :  { %v1616_v6 = vpop.xlane.xlu0 %1615 }
 0x570   :  { %4678 = vrcp.f32 %v1616_v6 }
 0x572   :  { %v4671_v18 = vpop.eup %4670 }
 0x573   :  { %v1619_v20 = vpop.xlane.xlu0 %1618  ;;  %v1674_v54 = vmul.f32 %v4671_v18, %v5551_v43  ;;  %v573_v43 = vpop.permute.xlu1 %572 }
 0x574   :  { %v4673_v58 = vpop.eup %4672 }
 0x575   :  { %v1672_v36 = vmul.f32 %v4673_v58, %v5553_v61  ;;  %v4675_v50 = vpop.eup %4674 }
 0x576   :  { %v1668_v56 = vmul.f32 %v4675_v50, %v5511_v10  ;;  %v4470_v50 = vld [vmem:[#allocation7 + $0x20] sm:$0xff]  }
 0x577   :  { %v577_v59 = vpop.permute.xlu0 %576  ;;  %v1699_v7 = vpack.c.bf16 %v1674_v54, %v1672_v36 }
 0x578   :  { %v4677_v60 = vpop.eup %4676 }
 0x579   :  { %v1670_v46 = vmul.f32 %v4677_v60, %v5561_v29  ;;  %4314 = vmatmul.mubr.msk.bf16.vlgmr.msra.gmra.mrb[60].mxu1 %vm582_vm1, %v1699_v7 }
 0x57a   :  { %4324 = vmatpush3.bf16.msra.mxu1 %v577_v59  ;;  %4325 = vmatprep.mubr.msk.bf16.mxu1 %vm4916_vm0, %v4915_v14  ;;  %v4679_v21 = vpop.eup %4678 }
 0x57b   :  { %v1698_v62 = vpack.c.bf16 %v1670_v46, %v1668_v56  ;;  %4335 = vmatprep.subr.bf16.mxu1 %v4466_v48  ;;  %v1682_v44 = vmul.f32 %v4679_v21, %v5565_v40 }
 0x57d   :  { %4308 = vmatmul.mubr.msk.bf16.vlgmr.msra.gmra.mrb[60].mxu0 %vm582_vm1, %v1698_v62 }
 0x57e   :  { %4318 = vmatpush3.bf16.msra.mxu0 %v573_v43  ;;  %4319 = vmatprep.mubr.msk.bf16.mxu0 %vm4916_vm0, %v4915_v14 }
 0x57f   :  { %4329 = vmatprep.subr.bf16.mxu0 %v4915_v14  ;;  %v1740_v10 = vpop.f32.mrb[36].mxu1 }
 0x580   :  { %v4243_v61 = vpop.f32.mrb[37].mxu1 }
 0x581   :  { %v1743_v29 = vpop.f32.mrb[38].mxu1 }
 0x582   :  { %v2407_v8 = vpack.c.bf16 %v1743_v29, %v1740_v10  ;;  %v4244_v5 = vpop.f32.mrb[39].mxu1 }
 0x58b   :  { %v1784_v9 = vpop.f32.mrb[40].mxu0 }
 0x58c   :  { %v4249_v23 = vpop.f32.mrb[41].mxu0 }
 0x58d   :  { %v1787_v24 = vpop.f32.mrb[42].mxu0 }
 0x58e   :  { %v2408_v47 = vpack.c.bf16 %v1787_v24, %v1784_v9  ;;  %v4250_v52 = vpop.f32.mrb[43].mxu0  ;;  %v4471_v24 = vld [vmem:[#allocation7 + $0x28] sm:$0xff]  }
 0x5a2   :  { %v1613_v51 = vpop.xlane.xlu1 %1612 }
 0x5a3   :  { %4680 = vrcp.f32 %v1613_v51 }
 0x5a4   :  { %4682 = vrcp.f32 %v1607_v0 }
 0x5a6   :  { %v1610_v17 = vpop.xlane.xlu1 %1609 }
 0x5a7   :  { %4684 = vrcp.f32 %v1610_v17 }
 0x5aa   :  { %v1622_v42 = vpop.xlane.xlu1 %1621 }
 0x5ab   :  { %4686 = vrcp.f32 %v1622_v42 }
 0x5ac   :  { %4688 = vrcp.f32 %v1619_v20 }
 0x5ad   :  { %v4681_v4 = vpop.eup %4680 }
 0x5ae   :  { %v1680_v12 = vmul.f32 %v4681_v4, %v5586_v1  ;;  %v4683_v41 = vpop.eup %4682  ;;  %v579_v34 = vpop.permute.xlu1 %578  ;;  %v4468_v1 = vld [vmem:[#allocation7 + $0x10] sm:$0xff]  }
 0x5af   :  { %v1676_v11 = vmul.f32 %v4683_v41, %v5557_v27 }
 0x5b0   :  { %v1701_v30 = vpack.c.bf16 %v1682_v44, %v1680_v12 }
 0x5b1   :  { %v4685_v38 = vpop.eup %4684 }
 0x5b2   :  { %v1678_v28 = vmul.f32 %v4685_v38, %v5588_v37  ;;  %4326 = vmatmul.mubr.msk.bf16.vlgmr.msra.gmra.mrb[64].mxu1 %vm582_vm1, %v1701_v30  ;;  %v4472_v30 = vld [vmem:[#allocation7 + $0x30] sm:$0xff]  }
 0x5b3   :  { %4337 = vmatprep.mubr.msk.bf16.mxu1 %vm582_vm1, %v2407_v8  ;;  %4336 = vmatpush3.bf16.msra.mxu1 %v4466_v48 }
 0x5b4   :  { %v1700_v35 = vpack.c.bf16 %v1678_v28, %v1676_v11  ;;  %4341 = vmatprep.subr.bf16.mxu1 %v4467_v13 }
 0x5b5   :  { %v4687_v45 = vpop.eup %4686 }
 0x5b6   :  { %4320 = vmatmul.mubr.msk.bf16.vlgmr.msra.gmra.mrb[64].mxu0 %vm582_vm1, %v1700_v35  ;;  %v4689_v40 = vpop.eup %4688  ;;  %v1686_v27 = vmul.f32 %v4687_v45, %v5594_v33 }
 0x5b7   :  { %4330 = vmatpush3.bf16.msra.mxu0 %v579_v34  ;;  %4331 = vmatprep.mubr.msk.bf16.mxu0 %vm4916_vm0, %v4915_v14  ;;  %v1684_v37 = vmul.f32 %v4689_v40, %v5571_v53 }
 0x5b9   :  { %v1702_v49 = vpack.c.bf16 %v1686_v27, %v1684_v37  ;;  %v4473_v37 = vld [vmem:[#allocation7 + $0x38] sm:$0xff]  }
 0x5ba   :  { %4338 = vmatmul.mubr.msk.bf16.vlgmr.msra.gmra.mrb[68].mxu1 %vm582_vm1, %v2408_v47 }
 0x5bb   :  { %4342 = vmatpush3.bf16.msra.mxu1 %v4467_v13 }
 0x5bc   :  { %4347 = vmatprep.subr.bf16.mxu1 %v4468_v1 }
 0x5be   :  { %4332 = vmatmul.mubr.msk.bf16.vlgmr.msra.gmra.mrb[68].mxu0 %vm582_vm1, %v1702_v49 }
 0x5bf   :  { %3270 = vmatprep.mubr.bf16.mxu0 %v4914_v39 }
 0x5ed   :  { %v1828_v26 = vpop.f32.mrb[40].mxu1 }
 0x5ee   :  { %v4255_v19 = vpop.f32.mrb[41].mxu1 }
 0x5ef   :  { %v1831_v3 = vpop.f32.mrb[42].mxu1 }
 0x5f0   :  { %v2409_v2 = vpack.c.bf16 %v1831_v3, %v1828_v26  ;;  %v4256_v57 = vpop.f32.mrb[43].mxu1 }
 0x5f1   :  { %v1872_v14 = vpop.f32.mrb[44].mxu0 }
 0x5f2   :  { %v4261_v55 = vpop.f32.mrb[45].mxu0  ;;  %4343 = vmatprep.mubr.msk.bf16.mxu1 %vm582_vm1, %v2409_v2 }
 0x5f3   :  { %v1875_v33 = vpop.f32.mrb[46].mxu0 }
 0x5f4   :  { %v2410_v53 = vpack.c.bf16 %v1875_v33, %v1872_v14  ;;  %v4262_v22 = vpop.f32.mrb[47].mxu0 }
 0x5f5   :  { %v1916_v31 = vpop.f32.mrb[44].mxu1 }
 0x5f6   :  { %v4267_v25 = vpop.f32.mrb[45].mxu1  ;;  %4344 = vmatmul.mubr.msk.bf16.vlgmr.msra.gmra.mrb[68].mxu1 %vm582_vm1, %v2410_v53 }
 0x5f7   :  { %v1919_v0 = vpop.f32.mrb[46].mxu1  ;;  %4348 = vmatpush3.bf16.msra.mxu1 %v4468_v1 }
 0x5f8   :  { %v2411_v63 = vpack.c.bf16 %v1919_v0, %v1916_v31  ;;  %v4268_v6 = vpop.f32.mrb[47].mxu1  ;;  %4353 = vmatprep.subr.bf16.mxu1 %v4469_v32 }
 0x5fa   :  { %4349 = vmatprep.mubr.msk.bf16.mxu1 %vm582_vm1, %v2411_v63  ;;  %v3903_v63 = vld [vmem:[%s5788_s6] ss:$0 sm:$0xff] }
 0x5fd   :  { %v1960_v18 = vpop.f32.mrb[48].mxu0 }
 0x5fe   :  { %v4273_v20 = vpop.f32.mrb[49].mxu0 }
 0x5ff   :  { %v1963_v58 = vpop.f32.mrb[50].mxu0 }
 0x600   :  { %v2412_v54 = vpack.c.bf16 %v1963_v58, %v1960_v18  ;;  %v4274_v36 = vpop.f32.mrb[51].mxu0 }
 0x601   :  { %v2004_v59 = vpop.f32.mrb[48].mxu1 }
 0x602   :  { %v4279_v7 = vpop.f32.mrb[49].mxu1  ;;  %4350 = vmatmul.mubr.msk.bf16.vlgmr.msra.gmra.mrb[68].mxu1 %vm582_vm1, %v2412_v54 }
 0x603   :  { %v2007_v48 = vpop.f32.mrb[50].mxu1  ;;  %4354 = vmatpush3.bf16.msra.mxu1 %v4469_v32 }
 0x604   :  { %v2413_v60 = vpack.c.bf16 %v2007_v48, %v2004_v59  ;;  %v4280_v56 = vpop.f32.mrb[51].mxu1  ;;  %4359 = vmatprep.subr.bf16.mxu1 %v4470_v50  ;;  %v4731_v48 = vld [vmem:[#allocation2 + $0x8] sm:$0xff] }
 0x605   :  { %v4732_v56 = vld [vmem:[#allocation2 + $0x10] sm:$0xff] }
 0x606   :  { %4355 = vmatprep.mubr.msk.bf16.mxu1 %vm582_vm1, %v2413_v60 }
 0x609   :  { %v2092_v46 = vpop.f32.mrb[52].mxu1 }
 0x60a   :  { %v4291_v62 = vpop.f32.mrb[53].mxu1 }
 0x60b   :  { %v2048_v43 = vpop.f32.mrb[52].mxu0  ;;  %v2095_v10 = vpop.f32.mrb[54].mxu1 }
 0x60c   :  { %v2415_v61 = vpack.c.bf16 %v2095_v10, %v2092_v46  ;;  %v4285_v29 = vpop.f32.mrb[53].mxu0  ;;  %v4292_v8 = vpop.f32.mrb[55].mxu1 }
 0x60d   :  { %v2051_v5 = vpop.f32.mrb[54].mxu0  ;;  %v4476_v29 = vld [vmem:[#allocation8 + $0x4] ss:$16 sps:$4 sm:$0xff]  }
 0x60e   :  { %v2414_v9 = vpack.c.bf16 %v2051_v5, %v2048_v43  ;;  %v4286_v23 = vpop.f32.mrb[55].mxu0  ;;  %v4733_v43 = vld [vmem:[#allocation2 + $0x18] sm:$0xff]  ;;  %v4479_v8 = vld [vmem:[#allocation8 + $0x24] ss:$16 sps:$4 sm:$0xff]   ;;  %3238 = vmatprep.subr.bf16.mxu0 %v4476_v29  ;;  %v4477_v5 = vld [vmem:[#allocation8 + $0x20] ss:$16 sps:$4 sm:$0xff]  }
 0x610   :  { %4356 = vmatmul.mubr.msk.bf16.vlgmr.msra.gmra.mrb[68].mxu1 %vm582_vm1, %v2414_v9 }
 0x611   :  { %v2180_v47 = vpop.f32.mrb[56].mxu1  ;;  %4361 = vmatprep.mubr.msk.bf16.mxu1 %vm582_vm1, %v2415_v61  ;;  %4360 = vmatpush3.bf16.msra.mxu1 %v4470_v50  ;;  %v4730_v50 = vld [vmem:[#allocation2] sm:$0xff] }
 0x612   :  { %v4303_v52 = vpop.f32.mrb[57].mxu1  ;;  %4365 = vmatprep.subr.bf16.mxu1 %v4471_v24  ;;  %v4474_v61 = vld [vmem:[#allocation8] ss:$16 sps:$4 sm:$0xff]  }
 0x613   :  { %v2136_v51 = vpop.f32.mrb[56].mxu0  ;;  %v2183_v17 = vpop.f32.mrb[58].mxu1  ;;  %3239 = vmatpush1.bf16.msra.mxu0 %v4474_v61  ;;  %v4735_v61 = vld [vmem:[%s5784_s2] ss:$0 sm:$0xff] }
 0x614   :  { %v2417_v42 = vpack.c.bf16 %v2183_v17, %v2180_v47  ;;  %v4297_v21 = vpop.f32.mrb[57].mxu0  ;;  %v4304_v4 = vpop.f32.mrb[59].mxu1  ;;  %3240 = vmatprep.subr.bf16.mxu0 %v4479_v8 }
 0x615   :  { %v2139_v44 = vpop.f32.mrb[58].mxu0 }
 0x616   :  { %v2416_v12 = vpack.c.bf16 %v2139_v44, %v2136_v51  ;;  %v4298_v41 = vpop.f32.mrb[59].mxu0 }
 0x617   :  { %3241 = vmatpush1.bf16.msra.mxu0 %v4477_v5 }
 0x61c   :  { %4362 = vmatmul.mubr.msk.bf16.vlgmr.msra.gmra.mrb[68].mxu1 %vm582_vm1, %v2416_v12 }
 0x61d   :  { %4367 = vmatprep.mubr.msk.bf16.mxu1 %vm582_vm1, %v2417_v42  ;;  %4366 = vmatpush3.bf16.msra.mxu1 %v4471_v24 }
 0x61e   :  { %4371 = vmatprep.subr.bf16.mxu1 %v4472_v30 }
 0x64c   :  { %v2268_v13 = vpop.f32.mrb[60].mxu1 }
 0x64d   :  { %v4315_v38 = vpop.f32.mrb[61].mxu1 }
 0x64e   :  { %v2271_v11 = vpop.f32.mrb[62].mxu1 }
 0x64f   :  { %v2419_v28 = vpack.c.bf16 %v2271_v11, %v2268_v13  ;;  %v4316_v35 = vpop.f32.mrb[63].mxu1  ;;  %v4482_v11 = vld [vmem:[#allocation8 + $0x44] ss:$16 sps:$4 sm:$0xff]  }
 0x650   :  { %v2224_v45 = vpop.f32.mrb[60].mxu0  ;;  %3242 = vmatprep.subr.bf16.mxu0 %v4482_v11  ;;  %v4485_v35 = vld [vmem:[#allocation8 + $0x64] ss:$16 sps:$4 sm:$0xff]   ;;  %v4510_v11 = vld [vmem:[#allocation8 + $0x88] ss:$16 sps:$4 sm:$0xff]  }
 0x651   :  { %v4309_v34 = vpop.f32.mrb[61].mxu0 }
 0x652   :  { %v2227_v40 = vpop.f32.mrb[62].mxu0  ;;  %v4488_v34 = vld [vmem:[#allocation8 + $0x84] ss:$16 sps:$4 sm:$0xff]  }
 0x653   :  { %v2418_v27 = vpack.c.bf16 %v2227_v40, %v2224_v45  ;;  %v4310_v1 = vpop.f32.mrb[63].mxu0  ;;  %v4483_v45 = vld [vmem:[#allocation8 + $0x60] ss:$16 sps:$4 sm:$0xff]  }
 0x654   :  { %v4486_v40 = vld [vmem:[#allocation8 + $0x80] ss:$16 sps:$4 sm:$0xff]  }
 0x655   :  { %4368 = vmatmul.mubr.msk.bf16.vlgmr.msra.gmra.mrb[68].mxu1 %vm582_vm1, %v2418_v27  ;;  %v4491_v27 = vld [vmem:[#allocation8 + $0xa4] ss:$16 sps:$4 sm:$0xff]   ;;  %v4489_v1 = vld [vmem:[#allocation8 + $0xa0] ss:$16 sps:$4 sm:$0xff]  }
 0x656   :  { %4373 = vmatprep.mubr.msk.bf16.mxu1 %vm582_vm1, %v2419_v28  ;;  %4372 = vmatpush3.bf16.msra.mxu1 %v4472_v30  ;;  %v4480_v28 = vld [vmem:[#allocation8 + $0x40] ss:$16 sps:$4 sm:$0xff]  }
 0x657   :  { %4377 = vmatprep.subr.bf16.mxu1 %v4473_v37  ;;  %3243 = vmatpush1.bf16.msra.mxu0 %v4480_v28  ;;  %v4515_v28 = vld [vmem:[#allocation8 + $0xac] ss:$16 sps:$4 sm:$0xff]  }
 0x658   :  { %3244 = vmatprep.subr.bf16.mxu0 %v4485_v35  ;;  %v4513_v35 = vld [vmem:[#allocation8 + $0xa8] ss:$16 sps:$4 sm:$0xff]  }
 0x65b   :  { %3245 = vmatpush1.bf16.msra.mxu0 %v4483_v45  ;;  %v4518_v45 = vld [vmem:[#allocation8 + $0xcc] ss:$16 sps:$4 sm:$0xff]  }
 0x65c   :  { %3246 = vmatprep.subr.bf16.mxu0 %v4488_v34  ;;  %v4516_v34 = vld [vmem:[#allocation8 + $0xc8] ss:$16 sps:$4 sm:$0xff]  }
 0x65f   :  { %3247 = vmatpush1.bf16.msra.mxu0 %v4486_v40  ;;  %v4521_v40 = vld [vmem:[#allocation8 + $0xec] ss:$16 sps:$4 sm:$0xff]  }
 0x660   :  { %3248 = vmatprep.subr.bf16.mxu0 %v4491_v27  ;;  %v4519_v27 = vld [vmem:[#allocation8 + $0xe8] ss:$16 sps:$4 sm:$0xff]  }
 0x663   :  { %3249 = vmatpush1.bf16.msra.mxu0 %v4489_v1  ;;  %v4526_v1 = vld [vmem:[#allocation11 + $0x50] sm:$0xff]  }
 0x685   :  { %v2356_v49 = vpop.f32.mrb[64].mxu1 }
 0x686   :  { %v4327_v26 = vpop.f32.mrb[65].mxu1 }
 0x687   :  { %v2359_v19 = vpop.f32.mrb[66].mxu1  ;;  %v4497_v26 = vld [vmem:[#allocation8 + $0xe4] ss:$16 sps:$4 sm:$0xff]  }
 0x688   :  { %v2421_v3 = vpack.c.bf16 %v2359_v19, %v2356_v49  ;;  %v4328_v2 = vpop.f32.mrb[67].mxu1  ;;  %v4492_v49 = vld [vmem:[#allocation8 + $0xc0] ss:$16 sps:$4 sm:$0xff]  }
 0x689   :  { %v2312_v57 = vpop.f32.mrb[64].mxu0  ;;  %v4495_v19 = vld [vmem:[#allocation8 + $0xe0] ss:$16 sps:$4 sm:$0xff]   ;;  %v4522_v2 = vld [vmem:[#allocation11 + $0x40] sm:$0xff]  }
 0x68a   :  { %v4321_v14 = vpop.f32.mrb[65].mxu0 }
 0x68b   :  { %v2315_v55 = vpop.f32.mrb[66].mxu0  ;;  %v4524_v14 = vld [vmem:[#allocation11 + $0x48] sm:$0xff]  }
 0x68c   :  { %v2420_v33 = vpack.c.bf16 %v2315_v55, %v2312_v57  ;;  %v4322_v53 = vpop.f32.mrb[67].mxu0  ;;  %v4523_v57 = vld [vmem:[#allocation11] sm:$0xff]   ;;  %v4525_v55 = vld [vmem:[#allocation11 + $0x8] sm:$0xff]  }
 0x68e   :  { %4374 = vmatmul.mubr.msk.bf16.vlgmr.msra.gmra.mrb[68].mxu1 %vm582_vm1, %v2420_v33 }
 0x68f   :  { %4378 = vmatpush3.bf16.msra.mxu1 %v4473_v37  ;;  %4379 = vmatprep.mubr.msk.bf16.mxu1 %vm582_vm1, %v2421_v3  ;;  %v4494_v37 = vld [vmem:[#allocation8 + $0xc4] ss:$16 sps:$4 sm:$0xff]   ;;  %v4500_v3 = vld [vmem:[#allocation8 + $0xc] ss:$16 sps:$4 sm:$0xff]  }
 0x690   :  { %3250 = vmatprep.subr.bf16.mxu0 %v4494_v37  ;;  %4067 = vmatprep.subr.bf16.mxu1 %v4522_v2  ;;  %v4527_v37 = vld [vmem:[#allocation11 + $0x10] sm:$0xff]   ;;  %v4532_v2 = vld [vmem:[#allocation11 + $0x68] sm:$0xff]  }
 0x691   :  { %v2400_v22 = vpop.f32.mrb[68].mxu0  ;;  %3251 = vmatpush1.bf16.msra.mxu0 %v4492_v49  ;;  %v4528_v49 = vld [vmem:[#allocation11 + $0x58] sm:$0xff]  }
 0x692   :  { %v4333_v32 = vpop.f32.mrb[69].mxu0  ;;  %3252 = vmatprep.subr.bf16.mxu0 %v4497_v26  ;;  %v4529_v26 = vld [vmem:[#allocation11 + $0x18] sm:$0xff]  }
 0x693   :  { %v2403_v31 = vpop.f32.mrb[70].mxu0 }
 0x694   :  { %v2422_v25 = vpack.c.bf16 %v2403_v31, %v2400_v22  ;;  %v4334_v0 = vpop.f32.mrb[71].mxu0 }
 0x695   :  { %3253 = vmatpush1.bf16.msra.mxu0 %v4495_v19  ;;  %v4530_v19 = vld [vmem:[#allocation11 + $0x60] sm:$0xff]  }
 0x696   :  { %3291 = vmatprep.subr.bf16.mxu0 %v4500_v3  ;;  %v4531_v3 = vld [vmem:[#allocation11 + $0x20] sm:$0xff]  }
 0x69a   :  { %4380 = vmatmul.mubr.msk.bf16.vlgmr.msra.gmra.mrb[68].mxu1 %vm582_vm1, %v2422_v25 }
 0x69b   :  { %4068 = vmatpush3.bf16.msra.mxu1 %v4523_v57  ;;  %v4533_v57 = vld [vmem:[#allocation11 + $0x28] sm:$0xff]  }
 0x69c   :  { %4069 = vmatprep.subr.bf16.mxu1 %v4524_v14  ;;  %v4534_v14 = vld [vmem:[#allocation11 + $0x70] sm:$0xff]  }
 0x69f   :  { %4070 = vmatpush3.bf16.msra.mxu1 %v4525_v55  ;;  %v4535_v55 = vld [vmem:[#allocation11 + $0x30] sm:$0xff]  }
 0x6a0   :  { %4071 = vmatprep.subr.bf16.mxu1 %v4526_v1 }
 0x6a3   :  { %4072 = vmatpush3.bf16.msra.mxu1 %v4527_v37 }
 0x6a4   :  { %4073 = vmatprep.subr.bf16.mxu1 %v4528_v49 }
 0x6a7   :  { %4074 = vmatpush3.bf16.msra.mxu1 %v4529_v26 }
 0x6a8   :  { %4075 = vmatprep.subr.bf16.mxu1 %v4530_v19 }
 0x6ab   :  { %4076 = vmatpush3.bf16.msra.mxu1 %v4531_v3 }
 0x6ac   :  { %4077 = vmatprep.subr.bf16.mxu1 %v4532_v2 }
 0x6af   :  { %4078 = vmatpush3.bf16.msra.mxu1 %v4533_v57 }
 0x6b0   :  { %4079 = vmatprep.subr.bf16.mxu1 %v4534_v14 }
 0x6b3   :  { %4080 = vmatpush3.bf16.msra.mxu1 %v4535_v55 }
 0x76d   :  { %v4381_v6 = vpop.f32.mrb[68].mxu1 }
 0x76e   :  { %v2912_v18 = vpop.f32.mrb[69].mxu1  ;;  %v2964_v36 = vadd.f32 %v4381_v6, %v3903_v63 }
 0x76f   :  { %v2962_v20 = vadd.f32 %v3903_v63, %v2912_v18  ;;  %v4382_v58 = vpop.f32.mrb[70].mxu1 }
 0x770   :  { %v2915_v54 = vpop.f32.mrb[71].mxu1  ;;  %v5707_v46 = vadd.f32 %v4732_v56, %v2964_v36  ;;  %v2965_v62 = vadd.f32 %v4382_v58, %v3903_v63 }
 0x771   :  { %v5702_v59 = vadd.f32 %v4730_v50, %v2962_v20  ;;  %v2963_v7 = vadd.f32 %v3903_v63, %v2915_v54 }
 0x772   :  { %v5711_v10 = vadd.f32 %v4733_v43, %v2965_v62 }
 0x773   :  { %v5704_v60 = vadd.f32 %v4731_v48, %v2963_v7  ;;  %2970 = vadd.xlane.f32.xlu0 %v5702_v59  ;;  %v4734_v48 = vld [vmem:[%s5783_s1] ss:$0 sm:$0xff] }
 0x775   :  { %2972 = vadd.xlane.f32.xlu1 %v5704_v60 }
 0x777   :  { %2974 = vadd.xlane.f32.xlu0 %v5707_v46 }
 0x77b   :  { %2976 = vadd.xlane.f32.xlu0 %v5711_v10 }
 0x800   :  { %v2971_v9 = vpop.xlane.xlu0 %2970 }
 0x801   :  { %v2978_v23 = vmul.f32 0.0078125, %v2971_v9 }
 0x802   :  { %v2973_v24 = vpop.xlane.xlu1 %2972 }
 0x803   :  { %v5715_v47 = vsub.f32 %v5702_v59, %v2978_v23  ;;  %v2979_v52 = vmul.f32 0.0078125, %v2973_v24  ;;  %v4498_v23 = vld [vmem:[#allocation8 + $0x8] ss:$16 sps:$4 sm:$0xff]  }
 0x804   :  { %v2975_v51 = vpop.xlane.xlu0 %2974 }
 0x805   :  { %v5718_v17 = vsub.f32 %v5704_v60, %v2979_v52  ;;  %v2980_v42 = vmul.f32 0.0078125, %v2975_v51  ;;  %v2986_v21 = vmul.f32 %v5715_v47, %v5715_v47 }
 0x807   :  { %v5723_v4 = vsub.f32 %v5707_v46, %v2980_v42  ;;  %2990 = vadd.xlane.f32.xlu0 %v2986_v21  ;;  %v2987_v44 = vmul.f32 %v5718_v17, %v5718_v17  ;;  %v4501_v42 = vld [vmem:[#allocation8 + $0x28] ss:$16 sps:$4 sm:$0xff]   ;;  %v4506_v21 = vld [vmem:[#allocation8 + $0x4c] ss:$16 sps:$4 sm:$0xff]  }
 0x808   :  { %v2977_v12 = vpop.xlane.xlu0 %2976 }
 0x809   :  { %v2981_v41 = vmul.f32 0.0078125, %v2977_v12  ;;  %2992 = vadd.xlane.f32.xlu1 %v2987_v44  ;;  %v2988_v30 = vmul.f32 %v5723_v4, %v5723_v4 }
 0x80b   :  { %v5730_v13 = vsub.f32 %v5711_v10, %v2981_v41  ;;  %2994 = vadd.xlane.f32.xlu0 %v2988_v30  ;;  %v4504_v41 = vld [vmem:[#allocation8 + $0x48] ss:$16 sps:$4 sm:$0xff]   ;;  %v4509_v30 = vld [vmem:[#allocation8 + $0x6c] ss:$16 sps:$4 sm:$0xff]  }
 0x80d   :  { %v2989_v38 = vmul.f32 %v5730_v13, %v5730_v13 }
 0x80f   :  { %2996 = vadd.xlane.f32.xlu1 %v2989_v38  ;;  %v4507_v38 = vld [vmem:[#allocation8 + $0x68] ss:$16 sps:$4 sm:$0xff]  }
 0x894   :  { %v2991_v33 = vpop.xlane.xlu0 %2990 }
 0x895   :  { %v2998_v53 = vmul.f32 0.0078125, %v2991_v33  ;;  %v4537_v33 = vld [vmem:[#allocation11 + $0x38] sm:$0xff]  }
 0x896   :  { %v2993_v22 = vpop.xlane.xlu1 %2992 }
 0x897   :  { %v3002_v32 = vadd.f32 1e-05, %v2998_v53  ;;  %v2999_v31 = vmul.f32 0.0078125, %v2993_v22  ;;  %v4538_v53 = vld [vmem:[#allocation11 + $0xc0] sm:$0xff]  }
 0x898   :  { %v2995_v25 = vpop.xlane.xlu0 %2994  ;;  %v4539_v22 = vld [vmem:[#allocation11 + $0x80] sm:$0xff]  }
 0x899   :  { %4690 = vrsqrt.f32 %v3002_v32  ;;  %v3003_v0 = vadd.f32 1e-05, %v2999_v31  ;;  %v3000_v63 = vmul.f32 0.0078125, %v2995_v25  ;;  %v4540_v32 = vld [vmem:[#allocation11 + $0xc8] sm:$0xff]   ;;  %v4542_v25 = vld [vmem:[#allocation11 + $0xd0] sm:$0xff]  }
 0x89a   :  { %v4541_v31 = vld [vmem:[#allocation11 + $0x88] sm:$0xff]  }
 0x89b   :  { %4692 = vrsqrt.f32 %v3003_v0  ;;  %v3004_v6 = vadd.f32 1e-05, %v3000_v63  ;;  %v4543_v0 = vld [vmem:[#allocation11 + $0x90] sm:$0xff]   ;;  %v4544_v63 = vld [vmem:[#allocation11 + $0xd8] sm:$0xff]  }
 0x89c   :  { %v2997_v18 = vpop.xlane.xlu1 %2996 }
 0x89d   :  { %4694 = vrsqrt.f32 %v3004_v6  ;;  %v3001_v20 = vmul.f32 0.0078125, %v2997_v18  ;;  %v4545_v6 = vld [vmem:[#allocation11 + $0x98] sm:$0xff]   ;;  %v4546_v18 = vld [vmem:[#allocation11 + $0xe0] sm:$0xff]  }
 0x89f   :  { %v3005_v58 = vadd.f32 1e-05, %v3001_v20  ;;  %v4547_v20 = vld [vmem:[#allocation11 + $0xa0] sm:$0xff]  }
 0x8a1   :  { %4696 = vrsqrt.f32 %v3005_v58  ;;  %v4548_v58 = vld [vmem:[#allocation11 + $0xe8] sm:$0xff]  }
 0x8a3   :  { %v4691_v54 = vpop.eup %4690 }
 0x8a4   :  { %v3010_v36 = vmul.f32 %v4691_v54, %v5715_v47  ;;  %v4503_v47 = vld [vmem:[#allocation8 + $0x2c] ss:$16 sps:$4 sm:$0xff]  }
 0x8a5   :  { %v4693_v50 = vpop.eup %4692  ;;  %v4549_v54 = vld [vmem:[#allocation11 + $0xa8] sm:$0xff]  }
 0x8a6   :  { %v3011_v7 = vmul.f32 %v4693_v50, %v5718_v17  ;;  %v3014_v56 = vmul.f32 %v4734_v48, %v3010_v36  ;;  %v4550_v36 = vld [vmem:[#allocation11 + $0xf0] sm:$0xff]  }
 0x8a7   :  { %v4695_v62 = vpop.eup %4694  ;;  %v4551_v50 = vld [vmem:[#allocation11 + $0xb0] sm:$0xff]  }
 0x8a8   :  { %v3015_v43 = vmul.f32 %v4734_v48, %v3011_v7  ;;  %v3018_v29 = vadd.f32 %v4735_v61, %v3014_v56  ;;  %v3012_v5 = vmul.f32 %v4695_v62, %v5723_v4  ;;  %v4552_v7 = vld [vmem:[#allocation11 + $0xf8] sm:$0xff]  }
 0x8a9   :  { %v5747_v56 = vld [vmem:[#allocation10] sm:$0xf] }
 0x8aa   :  { %v3019_v8 = vadd.f32 %v4735_v61, %v3015_v43  ;;  %v3016_v51 = vmul.f32 %v4734_v48, %v3012_v5  ;;  %v3061_v62 = vrot.slane %v5747_v56, %v229_v16  ;;  %v5796_v43 = vsub.s32 1, %v5106_v15 }
 0x8ab   :  { %v4697_v9 = vpop.eup %4696 }
 0x8ac   :  { %v3022_v24 = vpack.c.bf16 %v3019_v8, %v3018_v29  ;;  %v3013_v52 = vmul.f32 %v4697_v9, %v5730_v13  ;;  %v3020_v12 = vadd.f32 %v4735_v61, %v3016_v51  ;;  %v4512_v13 = vld [vmem:[#allocation8 + $0x8c] ss:$16 sps:$4 sm:$0xff]  }
 0x8ae   :  { %3271 = vmatmul.mubr.bf16.vlgmr.msra.gmra.mrb[72].mxu0 %v3022_v24  ;;  %v3017_v17 = vmul.f32 %v4734_v48, %v3013_v52  ;;  %v4553_v48 = vld [vmem:[#allocation11 + $0xb8] sm:$0xff]  }
 0x8af   :  { %3292 = vmatpush1.bf16.msra.mxu0 %v4498_v23  ;;  %3280 = vmatprep.mubr.bf16.mxu0 %v4914_v39 }
 0x8b0   :  { %3293 = vmatprep.subr.bf16.mxu0 %v4503_v47  ;;  %v3021_v44 = vadd.f32 %v4735_v61, %v3017_v17  ;;  %v3065_v61 = vrot.slane %v5747_v56, %v5796_v43 }
 0x8b2   :  { %v3023_v4 = vpack.c.bf16 %v3021_v44, %v3020_v12 }
 0x8b3   :  { %3294 = vmatpush1.bf16.msra.mxu0 %v4501_v42 }
 0x8b4   :  { %3295 = vmatprep.subr.bf16.mxu0 %v4506_v21 }
 0x8b6   :  { %3281 = vmatmul.mubr.bf16.gmra.mrb[76].mxu0 %v3023_v4 }
 0x8b7   :  { %3296 = vmatpush1.bf16.msra.mxu0 %v4504_v41  ;;  %3323 = vmatprep.mubr.bf16.mxu0 %v4914_v39 }
 0x8b8   :  { %3297 = vmatprep.subr.bf16.mxu0 %v4509_v30 }
 0x8bb   :  { %3298 = vmatpush1.bf16.msra.mxu0 %v4507_v38 }
 0x8bc   :  { %3299 = vmatprep.subr.bf16.mxu0 %v4512_v13 }
 0x8bf   :  { %3300 = vmatpush1.bf16.msra.mxu0 %v4510_v11 }
 0x8c0   :  { %3301 = vmatprep.subr.bf16.mxu0 %v4515_v28 }
 0x8c3   :  { %3302 = vmatpush1.bf16.msra.mxu0 %v4513_v35 }
 0x8c4   :  { %3303 = vmatprep.subr.bf16.mxu0 %v4518_v45 }
 0x8c7   :  { %3304 = vmatpush1.bf16.msra.mxu0 %v4516_v34 }
 0x8c8   :  { %3305 = vmatprep.subr.bf16.mxu0 %v4521_v40 }
 0x8cb   :  { %3306 = vmatpush1.bf16.msra.mxu0 %v4519_v27 }
 0x8cc   :  { %4095 = vmatprep.subr.bf16.mxu0 %v4538_v53 }
 0x8ce   :  { %3324 = vmatmul.mubr.bf16.vlgmr.msra.gmra.mrb[80].mxu0 %v3022_v24 }
 0x8cf   :  { %3333 = vmatprep.mubr.bf16.mxu0 %v4914_v39  ;;  %v4536_v39 = vld [vmem:[#allocation11 + $0x78] sm:$0xff]   ;;  %4096 = vmatpush3.bf16.msra.mxu0 %v4539_v22 }
 0x8d0   :  { %4081 = vmatprep.subr.bf16.mxu1 %v4536_v39  ;;  %4097 = vmatprep.subr.bf16.mxu0 %v4540_v32 }
 0x8d1   :  { %4082 = vmatpush3.bf16.msra.mxu1 %v4537_v33 }
 0x8d3   :  { %4098 = vmatpush3.bf16.msra.mxu0 %v4541_v31 }
 0x8d4   :  { %4099 = vmatprep.subr.bf16.mxu0 %v4542_v25 }
 0x8d6   :  { %3334 = vmatmul.mubr.bf16.gmra.mrb[84].mxu0 %v3023_v4 }
 0x8d7   :  { %4100 = vmatpush3.bf16.msra.mxu0 %v4543_v0 }
 0x8d8   :  { %4101 = vmatprep.subr.bf16.mxu0 %v4544_v63 }
 0x8db   :  { %4102 = vmatpush3.bf16.msra.mxu0 %v4545_v6 }
 0x8dc   :  { %4103 = vmatprep.subr.bf16.mxu0 %v4546_v18 }
 0x8df   :  { %4104 = vmatpush3.bf16.msra.mxu0 %v4547_v20 }
 0x8e0   :  { %4105 = vmatprep.subr.bf16.mxu0 %v4548_v58 }
 0x8e3   :  { %4106 = vmatpush3.bf16.msra.mxu0 %v4549_v54 }
 0x8e4   :  { %4107 = vmatprep.subr.bf16.mxu0 %v4550_v36  ;;  %v3072_v36 = vsub.s32 3, %v5106_v15 }
 0x8e7   :  { %4108 = vmatpush3.bf16.msra.mxu0 %v4551_v50 }
 0x8e8   :  { %4109 = vmatprep.subr.bf16.mxu0 %v4552_v7 }
 0x8eb   :  { %4110 = vmatpush3.bf16.msra.mxu0 %v4553_v48 }
 0x981   :  { %v3272_v29 = vpop.f32.mrb[72].mxu0 }
 0x982   :  { %v3273_v8 = vadd.f32 %v3272_v29, %v3061_v62  ;;  %v3274_v5 = vpop.f32.mrb[73].mxu0 }
 0x983   :  { %v3275_v9 = vadd.f32 %v3274_v5, %v3065_v61  ;;  %v3276_v23 = vpop.f32.mrb[74].mxu0 }
 0x984   :  { %v3360_v24 = vmul.f32 0.70710677, %v3273_v8  ;;  %v3277_v47 = vadd.f32 %v3276_v23, %v3061_v62  ;;  %v3278_v52 = vpop.f32.mrb[75].mxu0  ;;  %v3344_v26 = vmul.f32 0.5, %v3273_v8  ;;  %v5797_v8 = vsub.s32 2, %v5106_v15 }
 0x985   :  { %v3361_v51 = vmul.f32 0.70710677, %v3275_v9  ;;  %v3279_v17 = vadd.f32 %v3278_v52, %v3065_v61  ;;  %v3345_v2 = vmul.f32 0.5, %v3275_v9  ;;  %v3073_v9 = vrot.slane %v5747_v56, %v3072_v36 }
 0x986   :  { %4698 = verf.f32 %v3360_v24  ;;  %v3364_v42 = vmul.f32 0.70710677, %v3277_v47  ;;  %v3348_v19 = vmul.f32 0.5, %v3277_v47  ;;  %v3069_v5 = vrot.slane %v5747_v56, %v5797_v8 }
 0x987   :  { %4700 = verf.f32 %v3361_v51  ;;  %v3365_v21 = vmul.f32 0.70710677, %v3279_v17  ;;  %v3349_v57 = vmul.f32 0.5, %v3279_v17 }
 0x988   :  { %4702 = verf.f32 %v3364_v42 }
 0x989   :  { %4704 = verf.f32 %v3365_v21  ;;  %v3282_v16 = vpop.f32.mrb[76].mxu0 }
 0x98a   :  { %v3283_v44 = vadd.f32 %v3282_v16, %v3061_v62  ;;  %v3284_v12 = vpop.f32.mrb[77].mxu0 }
 0x98b   :  { %v3285_v41 = vadd.f32 %v3284_v12, %v3065_v61  ;;  %v3286_v4 = vpop.f32.mrb[78].mxu0 }
 0x98c   :  { %v3368_v30 = vmul.f32 0.70710677, %v3283_v44  ;;  %v3287_v38 = vadd.f32 %v3286_v4, %v3061_v62  ;;  %v3288_v13 = vpop.f32.mrb[79].mxu0  ;;  %v3352_v20 = vmul.f32 0.5, %v3283_v44 }
 0x98d   :  { %v3369_v11 = vmul.f32 0.70710677, %v3285_v41  ;;  %v3289_v28 = vadd.f32 %v3288_v13, %v3065_v61  ;;  %v3353_v50 = vmul.f32 0.5, %v3285_v41 }
 0x98e   :  { %4706 = verf.f32 %v3368_v30  ;;  %v3372_v35 = vmul.f32 0.70710677, %v3287_v38  ;;  %v3356_v58 = vmul.f32 0.5, %v3287_v38 }
 0x98f   :  { %4708 = verf.f32 %v3369_v11  ;;  %v3373_v45 = vmul.f32 0.70710677, %v3289_v28  ;;  %v3357_v7 = vmul.f32 0.5, %v3289_v28 }
 0x990   :  { %v4699_v34 = vpop.eup %4698  ;;  %4710 = verf.f32 %v3372_v35 }
 0x991   :  { %v4701_v40 = vpop.eup %4700  ;;  %v3392_v27 = vadd.f32 1.0, %v4699_v34  ;;  %4712 = verf.f32 %v3373_v45 }
 0x992   :  { %v4703_v1 = vpop.eup %4702  ;;  %v3393_v37 = vadd.f32 1.0, %v4701_v40 }
 0x993   :  { %v4705_v49 = vpop.eup %4704  ;;  %v3396_v3 = vadd.f32 1.0, %v4703_v1  ;;  %v3408_v55 = vmul.f32 %v3392_v27, %v3344_v26 }
 0x994   :  { %v3397_v14 = vadd.f32 1.0, %v4705_v49  ;;  %v3409_v33 = vmul.f32 %v3393_v37, %v3345_v2 }
 0x995   :  { %v3412_v39 = vmul.f32 %v3396_v3, %v3348_v19 }
 0x996   :  { %v3413_v53 = vmul.f32 %v3397_v14, %v3349_v57 }
 0x997   :  { %v3424_v22 = vpack.c.bf16 %v3412_v39, %v3408_v55 }
 0x998   :  { %v4707_v32 = vpop.eup %4706  ;;  %v3425_v31 = vpack.c.bf16 %v3413_v53, %v3409_v33 }
 0x999   :  { %v4709_v25 = vpop.eup %4708  ;;  %v3400_v0 = vadd.f32 1.0, %v4707_v32 }
 0x99a   :  { %v4711_v63 = vpop.eup %4710  ;;  %v3401_v6 = vadd.f32 1.0, %v4709_v25  ;;  %3727 = vmatprep.mubr.bf16.mxu1 %v3425_v31 }
 0x99b   :  { %v4713_v18 = vpop.eup %4712  ;;  %v3404_v54 = vadd.f32 1.0, %v4711_v63  ;;  %3728 = vmatmul.mubr.bf16.vlgmr.msra.gmra.mrb[72].mxu1 %v3424_v22  ;;  %v3416_v62 = vmul.f32 %v3400_v0, %v3352_v20 }
 0x99c   :  { %v3405_v48 = vadd.f32 1.0, %v4713_v18  ;;  %v3417_v61 = vmul.f32 %v3401_v6, %v3353_v50 }
 0x99d   :  { %v3420_v43 = vmul.f32 %v3404_v54, %v3356_v58 }
 0x99e   :  { %v3421_v29 = vmul.f32 %v3405_v48, %v3357_v7 }
 0x99f   :  { %v3428_v23 = vpack.c.bf16 %v3420_v43, %v3416_v62 }
 0x9a0   :  { %v3429_v24 = vpack.c.bf16 %v3421_v29, %v3417_v61 }
 0x9a1   :  { %v3325_v47 = vpop.f32.mrb[80].mxu0 }
 0x9a2   :  { %v3326_v52 = vadd.f32 %v3325_v47, %v3069_v5  ;;  %v3327_v51 = vpop.f32.mrb[81].mxu0  ;;  %3735 = vmatprep.mubr.bf16.mxu1 %v3429_v24 }
 0x9a3   :  { %v3328_v17 = vadd.f32 %v3327_v51, %v3073_v9  ;;  %v3329_v42 = vpop.f32.mrb[82].mxu0  ;;  %3736 = vmatmul.mubr.bf16.gmra.mrb[76].mxu1 %v3428_v23 }
 0x9a4   :  { %v3362_v21 = vmul.f32 0.70710677, %v3326_v52  ;;  %v3330_v16 = vadd.f32 %v3329_v42, %v3069_v5  ;;  %v3331_v44 = vpop.f32.mrb[83].mxu0  ;;  %v3346_v57 = vmul.f32 0.5, %v3326_v52 }
 0x9a5   :  { %v3363_v12 = vmul.f32 0.70710677, %v3328_v17  ;;  %v3332_v41 = vadd.f32 %v3331_v44, %v3073_v9  ;;  %v3347_v39 = vmul.f32 0.5, %v3328_v17 }
 0x9a6   :  { %4714 = verf.f32 %v3362_v21  ;;  %v3366_v15 = vmul.f32 0.70710677, %v3330_v16  ;;  %v3350_v14 = vmul.f32 0.5, %v3330_v16 }
 0x9a7   :  { %4716 = verf.f32 %v3363_v12  ;;  %v3367_v4 = vmul.f32 0.70710677, %v3332_v41  ;;  %v3351_v33 = vmul.f32 0.5, %v3332_v41 }
 0x9a8   :  { %4718 = verf.f32 %v3366_v15 }
 0x9a9   :  { %4720 = verf.f32 %v3367_v4  ;;  %v3335_v56 = vpop.f32.mrb[84].mxu0 }
 0x9aa   :  { %v3336_v30 = vadd.f32 %v3335_v56, %v3069_v5  ;;  %v3337_v38 = vpop.f32.mrb[85].mxu0  ;;  %v3936_v56 = vld [vmem:[%s5792_s10] ss:$0 sm:$0xff]  ;;  %s4922_s10 = smov [#allocation13]  }
 0x9ab   :  { %v3338_v13 = vadd.f32 %v3337_v38, %v3073_v9  ;;  %v3339_v11 = vpop.f32.mrb[86].mxu0  ;;  %s3806_s30 = sshll.u32 %s4922_s10, 4  ;;  %s3807_s30 = int_to_ptr.vmem [resolvable:$true] %s3806_s30 }
 0x9ac   :  { %v3370_v28 = vmul.f32 0.70710677, %v3336_v30  ;;  %v3340_v35 = vadd.f32 %v3339_v11, %v3069_v5  ;;  %v3341_v45 = vpop.f32.mrb[87].mxu0  ;;  %v3354_v50 = vmul.f32 0.5, %v3336_v30  ;;  %s4868_s12 = scalar_lea.vmem %s3807_s30, 512  ;;  %p4873_p7 = scmp.lt.s32.totalorder %s3807_s30, %s3807_s30 }
 0x9ad   :  { %v3371_v34 = vmul.f32 0.70710677, %v3338_v13  ;;  %v3342_v40 = vadd.f32 %v3341_v45, %v3073_v9  ;;  %v3355_v62 = vmul.f32 0.5, %v3338_v13  ;;  %p4869_p6 = scmp.ne.s32.totalorder %s3807_s30, %s4868_s12  ;;  %p4874_p8 = scmp.lt.s32.totalorder %s4868_s12, %s4868_s12 }
 0x9ae   :  { %4722 = verf.f32 %v3370_v28  ;;  %v3374_v27 = vmul.f32 0.70710677, %v3340_v35  ;;  %v3358_v7 = vmul.f32 0.5, %v3340_v35 }
 0x9af   :  { %4724 = verf.f32 %v3371_v34  ;;  %v3375_v1 = vmul.f32 0.70710677, %v3342_v40  ;;  %v3359_v43 = vmul.f32 0.5, %v3342_v40  ;;  %p4875_p9 = por %p4874_p8, %p4873_p7 }
 0x9b0   :  { %v4715_v37 = vpop.eup %4714  ;;  %4726 = verf.f32 %v3374_v27 }
 0x9b1   :  { %v4717_v49 = vpop.eup %4716  ;;  %v3394_v26 = vadd.f32 1.0, %v4715_v37  ;;  %4728 = verf.f32 %v3375_v1  ;;  %p4876_p10 = pnand %p4875_p9, %p4869_p6 }
 0x9b2   :  { %v4719_v19 = vpop.eup %4718  ;;  %v3395_v3 = vadd.f32 1.0, %v4717_v49 }
 0x9b3   :  { %v4721_v2 = vpop.eup %4720  ;;  %v3398_v55 = vadd.f32 1.0, %v4719_v19  ;;  %v3410_v22 = vmul.f32 %v3394_v26, %v3346_v57 }
 0x9b4   :  { %v3399_v53 = vadd.f32 1.0, %v4721_v2  ;;  %v3411_v31 = vmul.f32 %v3395_v3, %v3347_v39 }
 0x9b5   :  { %v3414_v32 = vmul.f32 %v3398_v55, %v3350_v14 }
 0x9b6   :  { %v3415_v25 = vmul.f32 %v3399_v53, %v3351_v33 }
 0x9b7   :  { %v3426_v0 = vpack.c.bf16 %v3414_v32, %v3410_v22 }
 0x9b8   :  { %v4723_v63 = vpop.eup %4722  ;;  %v3427_v6 = vpack.c.bf16 %v3415_v25, %v3411_v31 }
 0x9b9   :  { %v4725_v18 = vpop.eup %4724  ;;  %v3402_v20 = vadd.f32 1.0, %v4723_v63 }
 0x9ba   :  { %v4727_v58 = vpop.eup %4726  ;;  %v3403_v54 = vadd.f32 1.0, %v4725_v18  ;;  %3776 = vmatprep.mubr.bf16.mxu0 %v3427_v6 }
 0x9bb   :  { %v4729_v36 = vpop.eup %4728  ;;  %v3406_v48 = vadd.f32 1.0, %v4727_v58  ;;  %3777 = vmatmul.mubr.bf16.vlgmr.msra.gmra.mrb[88].mxu0 %v3426_v0  ;;  %v3418_v29 = vmul.f32 %v3402_v20, %v3354_v50 }
 0x9bc   :  { %v3407_v61 = vadd.f32 1.0, %v4729_v36  ;;  %v3419_v5 = vmul.f32 %v3403_v54, %v3355_v62 }
 0x9bd   :  { %v3422_v8 = vmul.f32 %v3406_v48, %v3358_v7 }
 0x9be   :  { %v3423_v9 = vmul.f32 %v3407_v61, %v3359_v43 }
 0x9bf   :  { %v3430_v23 = vpack.c.bf16 %v3422_v8, %v3418_v29 }
 0x9c0   :  { %v3431_v24 = vpack.c.bf16 %v3423_v9, %v3419_v5 }
 0x9c2   :  { %3784 = vmatprep.mubr.bf16.mxu0 %v3431_v24 }
 0x9c3   :  { %3785 = vmatmul.mubr.bf16.gmra.mrb[92].mxu0 %v3430_v23 }
 0xa6e   :  { %v4083_v47 = vpop.f32.mrb[72].mxu1 }
 0xa6f   :  { %v4084_v52 = vpop.f32.mrb[73].mxu1 }
 0xa70   :  { %v4085_v51 = vadd.f32 %v4084_v52, %v4083_v47  ;;  %v4086_v17 = vpop.f32.mrb[74].mxu1 }
 0xa71   :  { %v4087_v42 = vpop.f32.mrb[75].mxu1 }
 0xa72   :  { %v4088_v21 = vadd.f32 %v4087_v42, %v4086_v17  ;;  %v3730_v13 = vadd.f32 %v4085_v51, %v3936_v56 }
 0xa74   :  { %v3733_v45 = vadd.f32 %v4088_v21, %v3936_v56 }
 0xa76   :  { %v4089_v16 = vpop.f32.mrb[76].mxu1 }
 0xa77   :  { %v4090_v44 = vpop.f32.mrb[77].mxu1 }
 0xa78   :  { %v4091_v12 = vadd.f32 %v4090_v44, %v4089_v16  ;;  %v4092_v41 = vpop.f32.mrb[78].mxu1 }
 0xa79   :  { %v4093_v15 = vpop.f32.mrb[79].mxu1 }
 0xa7a   :  { %v4094_v4 = vadd.f32 %v4093_v15, %v4092_v41  ;;  %v3738_v19 = vadd.f32 %v4091_v12, %v3936_v56 }
 0xa7c   :  { %v3741_v14 = vadd.f32 %v4094_v4, %v3936_v56 }
 0xa8e   :  { %v4111_v30 = vpop.f32.mrb[88].mxu0 }
 0xa8f   :  { %v4112_v38 = vpop.f32.mrb[89].mxu0 }
 0xa90   :  { %v4113_v11 = vadd.f32 %v4112_v38, %v4111_v30  ;;  %v4114_v28 = vpop.f32.mrb[90].mxu0 }
 0xa91   :  { %v4115_v35 = vpop.f32.mrb[91].mxu0 }
 0xa92   :  { %v3779_v34 = vadd.f32 %v4113_v11, %v3730_v13  ;;  %v4116_v40 = vadd.f32 %v4115_v35, %v4114_v28 }
 0xa94   :  { %v3793_v27 = vadd.f32 %v3779_v34, %v5702_v59  ;;  %v3782_v1 = vadd.f32 %v4116_v40, %v3733_v45 }
 0xa96   :  { %3797 = vst [vmem:[#allocation13] sm:$0xff] %v3793_v27  ;;  %v3794_v37 = vadd.f32 %v3782_v1, %v5704_v60  ;;  %v4117_v49 = vpop.f32.mrb[92].mxu0 }
 0xa97   :  { %v4118_v26 = vpop.f32.mrb[93].mxu0 }
 0xa98   :  { %3798 = vst [vmem:[#allocation13 + $0x8] sm:$0xff] %v3794_v37  ;;  %v4119_v3 = vadd.f32 %v4118_v26, %v4117_v49  ;;  %v4120_v2 = vpop.f32.mrb[94].mxu0 }
 0xa99   :  { %v4121_v57 = vpop.f32.mrb[95].mxu0 }
 0xa9a   :  { %v3787_v55 = vadd.f32 %v4119_v3, %v3738_v19  ;;  %v4122_v39 = vadd.f32 %v4121_v57, %v4120_v2 }
 0xa9c   :  { %v3795_v33 = vadd.f32 %v3787_v55, %v5707_v46  ;;  %v3790_v53 = vadd.f32 %v4122_v39, %v3741_v14 }
 0xa9e   :  { %3799 = vst [vmem:[#allocation13 + $0x10] sm:$0xff] %v3795_v33  ;;  %v3796_v59 = vadd.f32 %v3790_v53, %v5711_v10 }
 0xaa0   :  { %3800 = vst [vmem:[#allocation13 + $0x18] sm:$0xff] %v3796_v59 }
 0xaa1   :  { %4879 = shalt.err (!%p4876_p10)
}
 0xaa2   :  { %s4880_s19 = scalar_lea.hbm %s5793_s11, 512 }
 0xaa3   :  { %p4881_p11 = scmp.ne.s32.totalorder %s5793_s11, %s4880_s19  ;;  %p4884_p12 = scmp.lt.u32.totalorder %s4880_s19, %s5793_s11 }
 0xaa5   :  { %p4886_p13 = pnand %p4884_p12, %p4881_p11 }
 0xaa7   :  { %4889 = shalt.err (!%p4886_p13)
}
 0xaa8   :  { %3812 = dma.vmem_to_hbm [thread:$0]  %s3807_s30, 512, %s5793_s11, [#allocation4], %s4907_s7, %s4907_s7, %s4908_s13  }
 0xaa9   :  { %4898 = dma.done.wait [#allocation4], 512  }
 0xaaa   :  { %4899 = vsyncadd [#allocation4], 4294966784 }
 0xaab   :  { %3816 = vsyncpa [#allocation3], 1 }
 0xaac   :  { %3817 = vsyncpa [#allocation6], 1 }
 0xaad   :  { %3818 = vsyncpa [#allocation9], 1 }
 0xaae   :  { %3819 = vsyncpa [#allocation12], 1 }
 0xaaf   :  { %3820 = vsyncpa [#allocation4], 1 }

</bundles_post_ra>
